<compile_context>
chip_gen: v7x
topology: tpu7x:2x2x1
jax: 0.10.0
libtpu: 0.0.40
codegen_flags: <defaults>
</compile_context>

<pallas_src>
import math
from functools import partial

import jax
import jax.numpy as jnp
from jax.experimental import pallas as pl
from jax.experimental.pallas import tpu as pltpu

LAYER1 = 128          # conv output channels per branch
LAYER2 = 128          # fc hidden size
KSIZE = 3             # conv1d kernel size
NBRANCH = 4           # input channels / conv branches
OUT_LANES = 128       # packed output slab width (lane-dense)
MEAN_COL = 64         # lane offset where action_mean is packed in the output slab
CONV_CHUNK = 256      # conv-output chunk width (256 matches v6e/v7x MXU; 128 ideal on v5e)
NCHUNK = (NBRANCH * LAYER1) // CONV_CHUNK   # = 2


def _round_up(n, m):
    return (n + m - 1) // m * m


def _actor_critic_kernel(x_ref, wconv_ref, wfc_ref, bfc_ref, whead_ref, bhead_ref,
                         eps_ref, out_ref, *, sigma, action_dim, lout, nchunk):
    xb = x_ref[...]                              # (TB, C*L+1) bf16, last col == 1 (bias)

    # Conv1d (shifted-weight matmul, bias folded) + ReLU + fc contraction,
    # all on the MXU with f32 accumulation, 256-wide chunks.
    acc = None
    for t in range(lout):                        # unrolled (lout = 8)
        for c in range(nchunk):                  # unrolled (nchunk = 2)
            conv = jnp.dot(xb, wconv_ref[t, c],
                           preferred_element_type=jnp.float32)       # (TB, 256)
            conv = jnp.maximum(conv, 0.0).astype(jnp.bfloat16)
            part = jnp.dot(conv, wfc_ref[t, c],
                           preferred_element_type=jnp.float32)       # (TB, 128)
            acc = part if acc is None else acc + part
    fc = jnp.maximum(acc + bfc_ref[...], 0.0).astype(jnp.bfloat16)    # (TB, 128)

    # Fused heads: cols [0:A] actor, [A] critic, [MEAN_COL:MEAN_COL+A] actor dup.
    heads = jnp.dot(fc, whead_ref[...],
                    preferred_element_type=jnp.float32) + bhead_ref[...]

    eps = eps_ref[...]                           # (TB, 128) f32, zero beyond col A
    sig = jax.nn.sigmoid(heads)
    act_or_mean = sig + sigma * eps              # action at [0:A]; mean at [MEAN_COL:...]

    log_norm = -0.5 * action_dim * (math.log(2.0 * math.pi) + 2.0 * math.log(sigma))
    logp = -0.5 * jnp.sum(eps * eps, axis=1, keepdims=True) + log_norm   # (TB, 1)

    lane = jax.lax.broadcasted_iota(jnp.int32, heads.shape, 1)
    is_act = lane < action_dim
    is_mean = (lane >= MEAN_COL) & (lane < MEAN_COL + action_dim)
    slab = jnp.where(is_act | is_mean, act_or_mean, heads)   # lane A keeps raw value
    slab = jnp.where(lane == action_dim + 1,
                     jnp.broadcast_to(logp, slab.shape), slab)
    out_ref[...] = slab                           # single lane-dense (TB, 128) store


def actor_critic_forward(x, params, eps, sigma):
    """x: (B, 4, L) f32; eps: (B, A) f32 ~ N(0, I).

    Returns (action (B,A), action_logprobs (B,), value (B,1), action_mean (B,A)).
    """
    B, C, L = x.shape
    A = eps.shape[1]
    Lout = L - KSIZE + 1
    KIN = C * L + 1                               # +1 = folded conv bias column
    assert C == NBRANCH
    assert A + 2 <= MEAN_COL and MEAN_COL + A <= OUT_LANES

    # Batch tile: cap at 512 rows; if there is enough work, guarantee >= 2 grid
    # steps so both v7x TensorCores get a share of the "parallel" axis.
    B8 = _round_up(max(B, 1), 8)
    if B8 >= 16:
        TB = min(512, _round_up((B8 + 1) // 2, 8))
    else:
        TB = B8
    B_pad = _round_up(B8, TB)

    # Flatten x to (B_pad, C*L) and append the constant-1 bias column (no im2col).
    x2d = x.reshape(B, C * L)
    x2d = jnp.pad(x2d, ((0, B_pad - B), (0, 0)))
    xk = jnp.concatenate([x2d, jnp.ones((B_pad, 1), x2d.dtype)],
                         axis=1).astype(jnp.bfloat16)                 # (B_pad, KIN)

    # Lane-pad eps to the output slab width so in-kernel math stays lane-dense.
    # (Must be exactly zero beyond column A and beyond row B.)
    eps_pad = jnp.zeros((B_pad, OUT_LANES), jnp.float32).at[:B, :A].set(eps)

    kernel = partial(_actor_critic_kernel, sigma=float(sigma),
                     action_dim=A, lout=Lout, nchunk=NCHUNK)
    grid = (B_pad // TB,)

    # Advisory cost estimate for XLA's scheduler.
    weight_bytes = sum(int(p.size) * p.dtype.itemsize for p in params.values())
    flops = 2 * B_pad * (Lout * (KIN * NBRANCH * LAYER1
                                 + NBRANCH * LAYER1 * LAYER2)
                         + LAYER2 * OUT_LANES)
    bytes_accessed = (xk.size * 2 + eps_pad.size * 4
                      + B_pad * OUT_LANES * 4 + weight_bytes)
    cost = pl.CostEstimate(flops=int(flops),
                           transcendentals=int(B_pad * OUT_LANES),
                           bytes_accessed=int(bytes_accessed))

    out = pl.pallas_call(
        kernel,
        out_shape=jax.ShapeDtypeStruct((B_pad, OUT_LANES), jnp.float32),
        grid=grid,
        in_specs=[
            pl.BlockSpec((TB, KIN), lambda i: (i, 0)),                     # x       (batch-tiled)
            pl.BlockSpec((Lout, NCHUNK, KIN, CONV_CHUNK),
                         lambda i: (0, 0, 0, 0)),                          # wconv4  (resident)
            pl.BlockSpec((Lout, NCHUNK, CONV_CHUNK, LAYER2),
                         lambda i: (0, 0, 0, 0)),                          # wfc4    (resident)
            pl.BlockSpec((1, LAYER2), lambda i: (0, 0)),                   # bfc     (resident)
            pl.BlockSpec((LAYER2, OUT_LANES), lambda i: (0, 0)),           # whead   (fused heads)
            pl.BlockSpec((1, OUT_LANES), lambda i: (0, 0)),                # bhead
            pl.BlockSpec((TB, OUT_LANES), lambda i: (i, 0)),               # eps     (batch-tiled)
        ],
        out_specs=pl.BlockSpec((TB, OUT_LANES), lambda i: (i, 0)),
        compiler_params=pltpu.CompilerParams(
            dimension_semantics=("parallel",)),                            # 2 TCs on v7x
        cost_estimate=cost,
    )(xk, params["wconv4"], params["wfc4"], params["bfc"],
      params["whead"], params["bhead"], eps_pad)

    action = out[:B, :A]
    value = out[:B, A:A + 1]
    logp = out[:B, A + 1]
    mean = out[:B, MEAN_COL:MEAN_COL + A]
    return action, logp, value, mean


def init_params(key, state_length, action_dim):
    """Synthetic parameters matching the module's init_params(), pre-packed for the kernel."""
    L = state_length
    Lout = L - KSIZE + 1                              # 8
    KIN = NBRANCH * L + 1
    num_fc_input = NBRANCH * LAYER1 * Lout            # 4096
    k_cw, k_fc, k_a, k_v = jax.random.split(key, 4)

    # Conv1d(1, 128, 3): xavier_uniform over (128, 1, 3); bias = 0.1.
    fan_in, fan_out = 1 * KSIZE, LAYER1 * KSIZE
    bound = math.sqrt(6.0 / (fan_in + fan_out))
    cw = jax.random.uniform(k_cw, (NBRANCH, LAYER1, KSIZE), jnp.float32, -bound, bound)

    # Per-t shifted conv weight with the bias folded into the last input row:
    #   wconv_full[t, ch*L + t + k, ch*128 + c] = cw[ch, c, k];  wconv_full[t, KIN-1, :] = 0.1
    wconv_full = jnp.zeros((Lout, KIN, NBRANCH * LAYER1), jnp.float32)
    for t in range(Lout):
        for ch in range(NBRANCH):
            for k in range(KSIZE):
                wconv_full = wconv_full.at[t, ch * L + t + k,
                                           ch * LAYER1:(ch + 1) * LAYER1].set(cw[ch, :, k])
        wconv_full = wconv_full.at[t, KIN - 1, :].set(0.1)     # folded conv bias
    wconv4 = (wconv_full.reshape(Lout, KIN, NCHUNK, CONV_CHUNK)
                        .transpose(0, 2, 1, 3))                # (Lout, NCHUNK, KIN, 256)

    # fc Linear(4096, 128): weight ~ N(0, 0.01), bias 0 (PyTorch (out, in) layout).
    wfc_pt = 0.01 * jax.random.normal(k_fc, (LAYER2, num_fc_input), jnp.float32)
    # Reorder PyTorch flatten index j = ch*1024 + c*8 + t -> wfc3[t, ch*128+c, h].
    wfc3 = (wfc_pt.reshape(LAYER2, NBRANCH, LAYER1, Lout)      # [h, ch, c, t]
                  .transpose(3, 1, 2, 0)                       # [t, ch, c, h]
                  .reshape(Lout, NBRANCH * LAYER1, LAYER2))
    wfc4 = wfc3.reshape(Lout, NCHUNK, CONV_CHUNK, LAYER2)      # (Lout, NCHUNK, 256, 128)
    bfc = jnp.zeros((1, LAYER2), jnp.float32)

    # Heads: actor Linear(128, A), critic Linear(128, 1), fused + lane-packed.
    wa_pt = 0.01 * jax.random.normal(k_a, (action_dim, LAYER2), jnp.float32)
    wv_pt = 0.01 * jax.random.normal(k_v, (1, LAYER2), jnp.float32)
    ba = jnp.zeros((action_dim,), jnp.float32)                 # PyTorch init: zero biases
    bv = jnp.zeros((1,), jnp.float32)
    whead = jnp.zeros((LAYER2, OUT_LANES), jnp.float32)
    whead = whead.at[:, :action_dim].set(wa_pt.T)
    whead = whead.at[:, action_dim].set(wv_pt[0])
    whead = whead.at[:, MEAN_COL:MEAN_COL + action_dim].set(wa_pt.T)   # dup -> mean slot
    bhead = jnp.zeros((1, OUT_LANES), jnp.float32)
    bhead = bhead.at[0, :action_dim].set(ba)
    bhead = bhead.at[0, action_dim].set(bv[0])
    bhead = bhead.at[0, MEAN_COL:MEAN_COL + action_dim].set(ba)       # dup actor bias too

    params = dict(wconv4=wconv4.astype(jnp.bfloat16),
                  wfc4=wfc4.astype(jnp.bfloat16), bfc=bfc,
                  whead=whead.astype(jnp.bfloat16), bhead=bhead)
    raw = dict(cw=cw, wfc_pt=wfc_pt, wa_pt=wa_pt, wv_pt=wv_pt)         # for the f32 reference
    return params, raw


def reference_forward(x, raw, eps, sigma):
    """Pure-JAX f32 reference mirroring the PyTorch forward exactly."""
    B, C, L = x.shape
    A = eps.shape[1]
    Lout = L - KSIZE + 1
    idx = jnp.arange(Lout)[:, None] + jnp.arange(KSIZE)[None, :]
    win = x[:, :, idx]                                                 # (B, 4, Lout, K)
    conv = jnp.maximum(jnp.einsum('bntk,nck->bnct', win, raw["cw"]) + 0.1, 0.0)
    merge = conv.reshape(B, C * LAYER1 * Lout)                         # PyTorch (ch, c, t) flatten
    fc = jnp.maximum(merge @ raw["wfc_pt"].T, 0.0)
    mean = jax.nn.sigmoid(fc @ raw["wa_pt"].T)
    value = fc @ raw["wv_pt"].T
    action = mean + sigma * eps
    logp = (-0.5 * jnp.sum(eps * eps, axis=1)
            - 0.5 * A * (math.log(2.0 * math.pi) + 2.0 * math.log(sigma)))
    return action, logp, value, mean


if __name__ == "__main__":
    # numFcInput = 4096 = 4 * 128 * (L - 2)  =>  state_length L = 10
    B, C, L, A = 2, 4, 10, 4
    exploration_param = 0.05                     # sigma; action_var = sigma^2

    key = jax.random.PRNGKey(0)
    k_x, k_p, k_eps = jax.random.split(key, 3)
    x = jax.random.normal(k_x, (B, C, L), dtype=jnp.float32)
    params, raw = init_params(k_p, L, A)
    eps = jax.random.normal(k_eps, (B, A), dtype=jnp.float32)

    action, logp, value, mean = actor_critic_forward(x, params, eps, exploration_param)
    jax.block_until_ready((action, logp, value, mean))

    assert action.shape == (B, A) and mean.shape == (B, A)
    assert logp.shape == (B,) and value.shape == (B, 1)

    ra, rl, rv, rm = reference_forward(x, raw, eps, exploration_param)
    assert jnp.allclose(action, ra, rtol=5e-2, atol=5e-2)
    assert jnp.allclose(mean, rm, rtol=5e-2, atol=5e-2)
    assert jnp.allclose(value, rv, rtol=5e-2, atol=5e-2)
    assert jnp.allclose(logp, rl, rtol=1e-3, atol=1e-3)
    print("KERNEL_OK")
</pallas_src>

<mosaic_0001>
module attributes {stable_mosaic.version = 11 : i64} {
  func.func @_actor_critic_kernel(%arg0: i32, %arg1: memref<8x41xbf16, #tpu.memory_space<vmem>>, %arg2: memref<8x2x41x256xbf16, #tpu.memory_space<vmem>>, %arg3: memref<8x2x256x128xbf16, #tpu.memory_space<vmem>>, %arg4: memref<1x128xf32, #tpu.memory_space<vmem>>, %arg5: memref<128x128xbf16, #tpu.memory_space<vmem>>, %arg6: memref<1x128xf32, #tpu.memory_space<vmem>>, %arg7: memref<8x128xf32, #tpu.memory_space<vmem>>, %arg8: memref<8x128xf32, #tpu.memory_space<vmem>>) attributes {dimension_semantics = [#tpu.dimension_semantics<parallel>], iteration_bounds = array<i64: 1>, scalar_prefetch = 0 : i64, scratch_operands = 0 : i64, tpu.core_type = #tpu.core_type<tc>, window_params = [{transform_indices = @transform_0, window_bounds = array<i64: 8, 41>}, {pipeline_mode = #tpu.pipeline_mode<synchronous>, transform_indices = @transform_1, window_bounds = array<i64: 8, 2, 41, 256>}, {pipeline_mode = #tpu.pipeline_mode<synchronous>, transform_indices = @transform_2, window_bounds = array<i64: 8, 2, 256, 128>}, {pipeline_mode = #tpu.pipeline_mode<synchronous>, transform_indices = @transform_3, window_bounds = array<i64: 1, 128>}, {pipeline_mode = #tpu.pipeline_mode<synchronous>, transform_indices = @transform_4, window_bounds = array<i64: 128, 128>}, {pipeline_mode = #tpu.pipeline_mode<synchronous>, transform_indices = @transform_5, window_bounds = array<i64: 1, 128>}, {transform_indices = @transform_6, window_bounds = array<i64: 8, 128>}, {transform_indices = @transform_7, window_bounds = array<i64: 8, 128>}]} {
    %c0 = arith.constant 0 : index
    %c0_0 = arith.constant 0 : index
    %0 = vector.load %arg1[%c0, %c0_0] : memref<8x41xbf16, #tpu.memory_space<vmem>>, vector<8x41xbf16>
    %c0_1 = arith.constant 0 : index
    %c0_2 = arith.constant 0 : index
    %c0_3 = arith.constant 0 : index
    %c0_4 = arith.constant 0 : index
    %1 = vector.load %arg2[%c0_1, %c0_2, %c0_3, %c0_4] : memref<8x2x41x256xbf16, #tpu.memory_space<vmem>>, vector<1x1x41x256xbf16>
    %2 = vector.shape_cast %1 : vector<1x1x41x256xbf16> to vector<41x256xbf16>
    %cst = arith.constant dense<0.000000e+00> : vector<8x256xf32>
    %3 = tpu.matmul %0, %2, %cst {dimension_numbers = #tpu.dot_dimension_numbers<[1], [0], [0], [1], [0, 0, 1, 1], [], []>} : vector<8x41xbf16>, vector<41x256xbf16>, vector<8x256xf32> -> vector<8x256xf32>
    %cst_5 = arith.constant 0.000000e+00 : f32
    %4 = vector.broadcast %cst_5 : f32 to vector<8x256xf32>
    %5 = arith.maximumf %3, %4 : vector<8x256xf32>
    %6 = arith.truncf %5 : vector<8x256xf32> to vector<8x256xbf16>
    %c0_6 = arith.constant 0 : index
    %c0_7 = arith.constant 0 : index
    %c0_8 = arith.constant 0 : index
    %c0_9 = arith.constant 0 : index
    %7 = vector.load %arg3[%c0_6, %c0_7, %c0_8, %c0_9] : memref<8x2x256x128xbf16, #tpu.memory_space<vmem>>, vector<1x1x256x128xbf16>
    %8 = vector.shape_cast %7 : vector<1x1x256x128xbf16> to vector<256x128xbf16>
    %cst_10 = arith.constant dense<0.000000e+00> : vector<8x128xf32>
    %9 = tpu.matmul %6, %8, %cst_10 {dimension_numbers = #tpu.dot_dimension_numbers<[1], [0], [0], [1], [0, 0, 1, 1], [], []>} : vector<8x256xbf16>, vector<256x128xbf16>, vector<8x128xf32> -> vector<8x128xf32>
    %c0_11 = arith.constant 0 : index
    %c1 = arith.constant 1 : index
    %c0_12 = arith.constant 0 : index
    %c0_13 = arith.constant 0 : index
    %10 = vector.load %arg2[%c0_11, %c1, %c0_12, %c0_13] : memref<8x2x41x256xbf16, #tpu.memory_space<vmem>>, vector<1x1x41x256xbf16>
    %11 = vector.shape_cast %10 : vector<1x1x41x256xbf16> to vector<41x256xbf16>
    %cst_14 = arith.constant dense<0.000000e+00> : vector<8x256xf32>
    %12 = tpu.matmul %0, %11, %cst_14 {dimension_numbers = #tpu.dot_dimension_numbers<[1], [0], [0], [1], [0, 0, 1, 1], [], []>} : vector<8x41xbf16>, vector<41x256xbf16>, vector<8x256xf32> -> vector<8x256xf32>
    %cst_15 = arith.constant 0.000000e+00 : f32
    %13 = vector.broadcast %cst_15 : f32 to vector<8x256xf32>
    %14 = arith.maximumf %12, %13 : vector<8x256xf32>
    %15 = arith.truncf %14 : vector<8x256xf32> to vector<8x256xbf16>
    %c0_16 = arith.constant 0 : index
    %c1_17 = arith.constant 1 : index
    %c0_18 = arith.constant 0 : index
    %c0_19 = arith.constant 0 : index
    %16 = vector.load %arg3[%c0_16, %c1_17, %c0_18, %c0_19] : memref<8x2x256x128xbf16, #tpu.memory_space<vmem>>, vector<1x1x256x128xbf16>
    %17 = vector.shape_cast %16 : vector<1x1x256x128xbf16> to vector<256x128xbf16>
    %cst_20 = arith.constant dense<0.000000e+00> : vector<8x128xf32>
    %18 = tpu.matmul %15, %17, %cst_20 {dimension_numbers = #tpu.dot_dimension_numbers<[1], [0], [0], [1], [0, 0, 1, 1], [], []>} : vector<8x256xbf16>, vector<256x128xbf16>, vector<8x128xf32> -> vector<8x128xf32>
    %19 = arith.addf %9, %18 : vector<8x128xf32>
    %c1_21 = arith.constant 1 : index
    %c0_22 = arith.constant 0 : index
    %c0_23 = arith.constant 0 : index
    %c0_24 = arith.constant 0 : index
    %20 = vector.load %arg2[%c1_21, %c0_22, %c0_23, %c0_24] : memref<8x2x41x256xbf16, #tpu.memory_space<vmem>>, vector<1x1x41x256xbf16>
    %21 = vector.shape_cast %20 : vector<1x1x41x256xbf16> to vector<41x256xbf16>
    %cst_25 = arith.constant dense<0.000000e+00> : vector<8x256xf32>
    %22 = tpu.matmul %0, %21, %cst_25 {dimension_numbers = #tpu.dot_dimension_numbers<[1], [0], [0], [1], [0, 0, 1, 1], [], []>} : vector<8x41xbf16>, vector<41x256xbf16>, vector<8x256xf32> -> vector<8x256xf32>
    %cst_26 = arith.constant 0.000000e+00 : f32
    %23 = vector.broadcast %cst_26 : f32 to vector<8x256xf32>
    %24 = arith.maximumf %22, %23 : vector<8x256xf32>
    %25 = arith.truncf %24 : vector<8x256xf32> to vector<8x256xbf16>
    %c1_27 = arith.constant 1 : index
    %c0_28 = arith.constant 0 : index
    %c0_29 = arith.constant 0 : index
    %c0_30 = arith.constant 0 : index
    %26 = vector.load %arg3[%c1_27, %c0_28, %c0_29, %c0_30] : memref<8x2x256x128xbf16, #tpu.memory_space<vmem>>, vector<1x1x256x128xbf16>
    %27 = vector.shape_cast %26 : vector<1x1x256x128xbf16> to vector<256x128xbf16>
    %cst_31 = arith.constant dense<0.000000e+00> : vector<8x128xf32>
    %28 = tpu.matmul %25, %27, %cst_31 {dimension_numbers = #tpu.dot_dimension_numbers<[1], [0], [0], [1], [0, 0, 1, 1], [], []>} : vector<8x256xbf16>, vector<256x128xbf16>, vector<8x128xf32> -> vector<8x128xf32>
    %29 = arith.addf %19, %28 : vector<8x128xf32>
    %c1_32 = arith.constant 1 : index
    %c1_33 = arith.constant 1 : index
    %c0_34 = arith.constant 0 : index
    %c0_35 = arith.constant 0 : index
    %30 = vector.load %arg2[%c1_32, %c1_33, %c0_34, %c0_35] : memref<8x2x41x256xbf16, #tpu.memory_space<vmem>>, vector<1x1x41x256xbf16>
    %31 = vector.shape_cast %30 : vector<1x1x41x256xbf16> to vector<41x256xbf16>
    %cst_36 = arith.constant dense<0.000000e+00> : vector<8x256xf32>
    %32 = tpu.matmul %0, %31, %cst_36 {dimension_numbers = #tpu.dot_dimension_numbers<[1], [0], [0], [1], [0, 0, 1, 1], [], []>} : vector<8x41xbf16>, vector<41x256xbf16>, vector<8x256xf32> -> vector<8x256xf32>
    %cst_37 = arith.constant 0.000000e+00 : f32
    %33 = vector.broadcast %cst_37 : f32 to vector<8x256xf32>
    %34 = arith.maximumf %32, %33 : vector<8x256xf32>
    %35 = arith.truncf %34 : vector<8x256xf32> to vector<8x256xbf16>
    %c1_38 = arith.constant 1 : index
    %c1_39 = arith.constant 1 : index
    %c0_40 = arith.constant 0 : index
    %c0_41 = arith.constant 0 : index
    %36 = vector.load %arg3[%c1_38, %c1_39, %c0_40, %c0_41] : memref<8x2x256x128xbf16, #tpu.memory_space<vmem>>, vector<1x1x256x128xbf16>
    %37 = vector.shape_cast %36 : vector<1x1x256x128xbf16> to vector<256x128xbf16>
    %cst_42 = arith.constant dense<0.000000e+00> : vector<8x128xf32>
    %38 = tpu.matmul %35, %37, %cst_42 {dimension_numbers = #tpu.dot_dimension_numbers<[1], [0], [0], [1], [0, 0, 1, 1], [], []>} : vector<8x256xbf16>, vector<256x128xbf16>, vector<8x128xf32> -> vector<8x128xf32>
    %39 = arith.addf %29, %38 : vector<8x128xf32>
    %c2 = arith.constant 2 : index
    %c0_43 = arith.constant 0 : index
    %c0_44 = arith.constant 0 : index
    %c0_45 = arith.constant 0 : index
    %40 = vector.load %arg2[%c2, %c0_43, %c0_44, %c0_45] : memref<8x2x41x256xbf16, #tpu.memory_space<vmem>>, vector<1x1x41x256xbf16>
    %41 = vector.shape_cast %40 : vector<1x1x41x256xbf16> to vector<41x256xbf16>
    %cst_46 = arith.constant dense<0.000000e+00> : vector<8x256xf32>
    %42 = tpu.matmul %0, %41, %cst_46 {dimension_numbers = #tpu.dot_dimension_numbers<[1], [0], [0], [1], [0, 0, 1, 1], [], []>} : vector<8x41xbf16>, vector<41x256xbf16>, vector<8x256xf32> -> vector<8x256xf32>
    %cst_47 = arith.constant 0.000000e+00 : f32
    %43 = vector.broadcast %cst_47 : f32 to vector<8x256xf32>
    %44 = arith.maximumf %42, %43 : vector<8x256xf32>
    %45 = arith.truncf %44 : vector<8x256xf32> to vector<8x256xbf16>
    %c2_48 = arith.constant 2 : index
    %c0_49 = arith.constant 0 : index
    %c0_50 = arith.constant 0 : index
    %c0_51 = arith.constant 0 : index
    %46 = vector.load %arg3[%c2_48, %c0_49, %c0_50, %c0_51] : memref<8x2x256x128xbf16, #tpu.memory_space<vmem>>, vector<1x1x256x128xbf16>
    %47 = vector.shape_cast %46 : vector<1x1x256x128xbf16> to vector<256x128xbf16>
    %cst_52 = arith.constant dense<0.000000e+00> : vector<8x128xf32>
    %48 = tpu.matmul %45, %47, %cst_52 {dimension_numbers = #tpu.dot_dimension_numbers<[1], [0], [0], [1], [0, 0, 1, 1], [], []>} : vector<8x256xbf16>, vector<256x128xbf16>, vector<8x128xf32> -> vector<8x128xf32>
    %49 = arith.addf %39, %48 : vector<8x128xf32>
    %c2_53 = arith.constant 2 : index
    %c1_54 = arith.constant 1 : index
    %c0_55 = arith.constant 0 : index
    %c0_56 = arith.constant 0 : index
    %50 = vector.load %arg2[%c2_53, %c1_54, %c0_55, %c0_56] : memref<8x2x41x256xbf16, #tpu.memory_space<vmem>>, vector<1x1x41x256xbf16>
    %51 = vector.shape_cast %50 : vector<1x1x41x256xbf16> to vector<41x256xbf16>
    %cst_57 = arith.constant dense<0.000000e+00> : vector<8x256xf32>
    %52 = tpu.matmul %0, %51, %cst_57 {dimension_numbers = #tpu.dot_dimension_numbers<[1], [0], [0], [1], [0, 0, 1, 1], [], []>} : vector<8x41xbf16>, vector<41x256xbf16>, vector<8x256xf32> -> vector<8x256xf32>
    %cst_58 = arith.constant 0.000000e+00 : f32
    %53 = vector.broadcast %cst_58 : f32 to vector<8x256xf32>
    %54 = arith.maximumf %52, %53 : vector<8x256xf32>
    %55 = arith.truncf %54 : vector<8x256xf32> to vector<8x256xbf16>
    %c2_59 = arith.constant 2 : index
    %c1_60 = arith.constant 1 : index
    %c0_61 = arith.constant 0 : index
    %c0_62 = arith.constant 0 : index
    %56 = vector.load %arg3[%c2_59, %c1_60, %c0_61, %c0_62] : memref<8x2x256x128xbf16, #tpu.memory_space<vmem>>, vector<1x1x256x128xbf16>
    %57 = vector.shape_cast %56 : vector<1x1x256x128xbf16> to vector<256x128xbf16>
    %cst_63 = arith.constant dense<0.000000e+00> : vector<8x128xf32>
    %58 = tpu.matmul %55, %57, %cst_63 {dimension_numbers = #tpu.dot_dimension_numbers<[1], [0], [0], [1], [0, 0, 1, 1], [], []>} : vector<8x256xbf16>, vector<256x128xbf16>, vector<8x128xf32> -> vector<8x128xf32>
    %59 = arith.addf %49, %58 : vector<8x128xf32>
    %c3 = arith.constant 3 : index
    %c0_64 = arith.constant 0 : index
    %c0_65 = arith.constant 0 : index
    %c0_66 = arith.constant 0 : index
    %60 = vector.load %arg2[%c3, %c0_64, %c0_65, %c0_66] : memref<8x2x41x256xbf16, #tpu.memory_space<vmem>>, vector<1x1x41x256xbf16>
    %61 = vector.shape_cast %60 : vector<1x1x41x256xbf16> to vector<41x256xbf16>
    %cst_67 = arith.constant dense<0.000000e+00> : vector<8x256xf32>
    %62 = tpu.matmul %0, %61, %cst_67 {dimension_numbers = #tpu.dot_dimension_numbers<[1], [0], [0], [1], [0, 0, 1, 1], [], []>} : vector<8x41xbf16>, vector<41x256xbf16>, vector<8x256xf32> -> vector<8x256xf32>
    %cst_68 = arith.constant 0.000000e+00 : f32
    %63 = vector.broadcast %cst_68 : f32 to vector<8x256xf32>
    %64 = arith.maximumf %62, %63 : vector<8x256xf32>
    %65 = arith.truncf %64 : vector<8x256xf32> to vector<8x256xbf16>
    %c3_69 = arith.constant 3 : index
    %c0_70 = arith.constant 0 : index
    %c0_71 = arith.constant 0 : index
    %c0_72 = arith.constant 0 : index
    %66 = vector.load %arg3[%c3_69, %c0_70, %c0_71, %c0_72] : memref<8x2x256x128xbf16, #tpu.memory_space<vmem>>, vector<1x1x256x128xbf16>
    %67 = vector.shape_cast %66 : vector<1x1x256x128xbf16> to vector<256x128xbf16>
    %cst_73 = arith.constant dense<0.000000e+00> : vector<8x128xf32>
    %68 = tpu.matmul %65, %67, %cst_73 {dimension_numbers = #tpu.dot_dimension_numbers<[1], [0], [0], [1], [0, 0, 1, 1], [], []>} : vector<8x256xbf16>, vector<256x128xbf16>, vector<8x128xf32> -> vector<8x128xf32>
    %69 = arith.addf %59, %68 : vector<8x128xf32>
    %c3_74 = arith.constant 3 : index
    %c1_75 = arith.constant 1 : index
    %c0_76 = arith.constant 0 : index
    %c0_77 = arith.constant 0 : index
    %70 = vector.load %arg2[%c3_74, %c1_75, %c0_76, %c0_77] : memref<8x2x41x256xbf16, #tpu.memory_space<vmem>>, vector<1x1x41x256xbf16>
    %71 = vector.shape_cast %70 : vector<1x1x41x256xbf16> to vector<41x256xbf16>
    %cst_78 = arith.constant dense<0.000000e+00> : vector<8x256xf32>
    %72 = tpu.matmul %0, %71, %cst_78 {dimension_numbers = #tpu.dot_dimension_numbers<[1], [0], [0], [1], [0, 0, 1, 1], [], []>} : vector<8x41xbf16>, vector<41x256xbf16>, vector<8x256xf32> -> vector<8x256xf32>
    %cst_79 = arith.constant 0.000000e+00 : f32
    %73 = vector.broadcast %cst_79 : f32 to vector<8x256xf32>
    %74 = arith.maximumf %72, %73 : vector<8x256xf32>
    %75 = arith.truncf %74 : vector<8x256xf32> to vector<8x256xbf16>
    %c3_80 = arith.constant 3 : index
    %c1_81 = arith.constant 1 : index
    %c0_82 = arith.constant 0 : index
    %c0_83 = arith.constant 0 : index
    %76 = vector.load %arg3[%c3_80, %c1_81, %c0_82, %c0_83] : memref<8x2x256x128xbf16, #tpu.memory_space<vmem>>, vector<1x1x256x128xbf16>
    %77 = vector.shape_cast %76 : vector<1x1x256x128xbf16> to vector<256x128xbf16>
    %cst_84 = arith.constant dense<0.000000e+00> : vector<8x128xf32>
    %78 = tpu.matmul %75, %77, %cst_84 {dimension_numbers = #tpu.dot_dimension_numbers<[1], [0], [0], [1], [0, 0, 1, 1], [], []>} : vector<8x256xbf16>, vector<256x128xbf16>, vector<8x128xf32> -> vector<8x128xf32>
    %79 = arith.addf %69, %78 : vector<8x128xf32>
    %c4 = arith.constant 4 : index
    %c0_85 = arith.constant 0 : index
    %c0_86 = arith.constant 0 : index
    %c0_87 = arith.constant 0 : index
    %80 = vector.load %arg2[%c4, %c0_85, %c0_86, %c0_87] : memref<8x2x41x256xbf16, #tpu.memory_space<vmem>>, vector<1x1x41x256xbf16>
    %81 = vector.shape_cast %80 : vector<1x1x41x256xbf16> to vector<41x256xbf16>
    %cst_88 = arith.constant dense<0.000000e+00> : vector<8x256xf32>
    %82 = tpu.matmul %0, %81, %cst_88 {dimension_numbers = #tpu.dot_dimension_numbers<[1], [0], [0], [1], [0, 0, 1, 1], [], []>} : vector<8x41xbf16>, vector<41x256xbf16>, vector<8x256xf32> -> vector<8x256xf32>
    %cst_89 = arith.constant 0.000000e+00 : f32
    %83 = vector.broadcast %cst_89 : f32 to vector<8x256xf32>
    %84 = arith.maximumf %82, %83 : vector<8x256xf32>
    %85 = arith.truncf %84 : vector<8x256xf32> to vector<8x256xbf16>
    %c4_90 = arith.constant 4 : index
    %c0_91 = arith.constant 0 : index
    %c0_92 = arith.constant 0 : index
    %c0_93 = arith.constant 0 : index
    %86 = vector.load %arg3[%c4_90, %c0_91, %c0_92, %c0_93] : memref<8x2x256x128xbf16, #tpu.memory_space<vmem>>, vector<1x1x256x128xbf16>
    %87 = vector.shape_cast %86 : vector<1x1x256x128xbf16> to vector<256x128xbf16>
    %cst_94 = arith.constant dense<0.000000e+00> : vector<8x128xf32>
    %88 = tpu.matmul %85, %87, %cst_94 {dimension_numbers = #tpu.dot_dimension_numbers<[1], [0], [0], [1], [0, 0, 1, 1], [], []>} : vector<8x256xbf16>, vector<256x128xbf16>, vector<8x128xf32> -> vector<8x128xf32>
    %89 = arith.addf %79, %88 : vector<8x128xf32>
    %c4_95 = arith.constant 4 : index
    %c1_96 = arith.constant 1 : index
    %c0_97 = arith.constant 0 : index
    %c0_98 = arith.constant 0 : index
    %90 = vector.load %arg2[%c4_95, %c1_96, %c0_97, %c0_98] : memref<8x2x41x256xbf16, #tpu.memory_space<vmem>>, vector<1x1x41x256xbf16>
    %91 = vector.shape_cast %90 : vector<1x1x41x256xbf16> to vector<41x256xbf16>
    %cst_99 = arith.constant dense<0.000000e+00> : vector<8x256xf32>
    %92 = tpu.matmul %0, %91, %cst_99 {dimension_numbers = #tpu.dot_dimension_numbers<[1], [0], [0], [1], [0, 0, 1, 1], [], []>} : vector<8x41xbf16>, vector<41x256xbf16>, vector<8x256xf32> -> vector<8x256xf32>
    %cst_100 = arith.constant 0.000000e+00 : f32
    %93 = vector.broadcast %cst_100 : f32 to vector<8x256xf32>
    %94 = arith.maximumf %92, %93 : vector<8x256xf32>
    %95 = arith.truncf %94 : vector<8x256xf32> to vector<8x256xbf16>
    %c4_101 = arith.constant 4 : index
    %c1_102 = arith.constant 1 : index
    %c0_103 = arith.constant 0 : index
    %c0_104 = arith.constant 0 : index
    %96 = vector.load %arg3[%c4_101, %c1_102, %c0_103, %c0_104] : memref<8x2x256x128xbf16, #tpu.memory_space<vmem>>, vector<1x1x256x128xbf16>
    %97 = vector.shape_cast %96 : vector<1x1x256x128xbf16> to vector<256x128xbf16>
    %cst_105 = arith.constant dense<0.000000e+00> : vector<8x128xf32>
    %98 = tpu.matmul %95, %97, %cst_105 {dimension_numbers = #tpu.dot_dimension_numbers<[1], [0], [0], [1], [0, 0, 1, 1], [], []>} : vector<8x256xbf16>, vector<256x128xbf16>, vector<8x128xf32> -> vector<8x128xf32>
    %99 = arith.addf %89, %98 : vector<8x128xf32>
    %c5 = arith.constant 5 : index
    %c0_106 = arith.constant 0 : index
    %c0_107 = arith.constant 0 : index
    %c0_108 = arith.constant 0 : index
    %100 = vector.load %arg2[%c5, %c0_106, %c0_107, %c0_108] : memref<8x2x41x256xbf16, #tpu.memory_space<vmem>>, vector<1x1x41x256xbf16>
    %101 = vector.shape_cast %100 : vector<1x1x41x256xbf16> to vector<41x256xbf16>
    %cst_109 = arith.constant dense<0.000000e+00> : vector<8x256xf32>
    %102 = tpu.matmul %0, %101, %cst_109 {dimension_numbers = #tpu.dot_dimension_numbers<[1], [0], [0], [1], [0, 0, 1, 1], [], []>} : vector<8x41xbf16>, vector<41x256xbf16>, vector<8x256xf32> -> vector<8x256xf32>
    %cst_110 = arith.constant 0.000000e+00 : f32
    %103 = vector.broadcast %cst_110 : f32 to vector<8x256xf32>
    %104 = arith.maximumf %102, %103 : vector<8x256xf32>
    %105 = arith.truncf %104 : vector<8x256xf32> to vector<8x256xbf16>
    %c5_111 = arith.constant 5 : index
    %c0_112 = arith.constant 0 : index
    %c0_113 = arith.constant 0 : index
    %c0_114 = arith.constant 0 : index
    %106 = vector.load %arg3[%c5_111, %c0_112, %c0_113, %c0_114] : memref<8x2x256x128xbf16, #tpu.memory_space<vmem>>, vector<1x1x256x128xbf16>
    %107 = vector.shape_cast %106 : vector<1x1x256x128xbf16> to vector<256x128xbf16>
    %cst_115 = arith.constant dense<0.000000e+00> : vector<8x128xf32>
    %108 = tpu.matmul %105, %107, %cst_115 {dimension_numbers = #tpu.dot_dimension_numbers<[1], [0], [0], [1], [0, 0, 1, 1], [], []>} : vector<8x256xbf16>, vector<256x128xbf16>, vector<8x128xf32> -> vector<8x128xf32>
    %109 = arith.addf %99, %108 : vector<8x128xf32>
    %c5_116 = arith.constant 5 : index
    %c1_117 = arith.constant 1 : index
    %c0_118 = arith.constant 0 : index
    %c0_119 = arith.constant 0 : index
    %110 = vector.load %arg2[%c5_116, %c1_117, %c0_118, %c0_119] : memref<8x2x41x256xbf16, #tpu.memory_space<vmem>>, vector<1x1x41x256xbf16>
    %111 = vector.shape_cast %110 : vector<1x1x41x256xbf16> to vector<41x256xbf16>
    %cst_120 = arith.constant dense<0.000000e+00> : vector<8x256xf32>
    %112 = tpu.matmul %0, %111, %cst_120 {dimension_numbers = #tpu.dot_dimension_numbers<[1], [0], [0], [1], [0, 0, 1, 1], [], []>} : vector<8x41xbf16>, vector<41x256xbf16>, vector<8x256xf32> -> vector<8x256xf32>
    %cst_121 = arith.constant 0.000000e+00 : f32
    %113 = vector.broadcast %cst_121 : f32 to vector<8x256xf32>
    %114 = arith.maximumf %112, %113 : vector<8x256xf32>
    %115 = arith.truncf %114 : vector<8x256xf32> to vector<8x256xbf16>
    %c5_122 = arith.constant 5 : index
    %c1_123 = arith.constant 1 : index
    %c0_124 = arith.constant 0 : index
    %c0_125 = arith.constant 0 : index
    %116 = vector.load %arg3[%c5_122, %c1_123, %c0_124, %c0_125] : memref<8x2x256x128xbf16, #tpu.memory_space<vmem>>, vector<1x1x256x128xbf16>
    %117 = vector.shape_cast %116 : vector<1x1x256x128xbf16> to vector<256x128xbf16>
    %cst_126 = arith.constant dense<0.000000e+00> : vector<8x128xf32>
    %118 = tpu.matmul %115, %117, %cst_126 {dimension_numbers = #tpu.dot_dimension_numbers<[1], [0], [0], [1], [0, 0, 1, 1], [], []>} : vector<8x256xbf16>, vector<256x128xbf16>, vector<8x128xf32> -> vector<8x128xf32>
    %119 = arith.addf %109, %118 : vector<8x128xf32>
    %c6 = arith.constant 6 : index
    %c0_127 = arith.constant 0 : index
    %c0_128 = arith.constant 0 : index
    %c0_129 = arith.constant 0 : index
    %120 = vector.load %arg2[%c6, %c0_127, %c0_128, %c0_129] : memref<8x2x41x256xbf16, #tpu.memory_space<vmem>>, vector<1x1x41x256xbf16>
    %121 = vector.shape_cast %120 : vector<1x1x41x256xbf16> to vector<41x256xbf16>
    %cst_130 = arith.constant dense<0.000000e+00> : vector<8x256xf32>
    %122 = tpu.matmul %0, %121, %cst_130 {dimension_numbers = #tpu.dot_dimension_numbers<[1], [0], [0], [1], [0, 0, 1, 1], [], []>} : vector<8x41xbf16>, vector<41x256xbf16>, vector<8x256xf32> -> vector<8x256xf32>
    %cst_131 = arith.constant 0.000000e+00 : f32
    %123 = vector.broadcast %cst_131 : f32 to vector<8x256xf32>
    %124 = arith.maximumf %122, %123 : vector<8x256xf32>
    %125 = arith.truncf %124 : vector<8x256xf32> to vector<8x256xbf16>
    %c6_132 = arith.constant 6 : index
    %c0_133 = arith.constant 0 : index
    %c0_134 = arith.constant 0 : index
    %c0_135 = arith.constant 0 : index
    %126 = vector.load %arg3[%c6_132, %c0_133, %c0_134, %c0_135] : memref<8x2x256x128xbf16, #tpu.memory_space<vmem>>, vector<1x1x256x128xbf16>
    %127 = vector.shape_cast %126 : vector<1x1x256x128xbf16> to vector<256x128xbf16>
    %cst_136 = arith.constant dense<0.000000e+00> : vector<8x128xf32>
    %128 = tpu.matmul %125, %127, %cst_136 {dimension_numbers = #tpu.dot_dimension_numbers<[1], [0], [0], [1], [0, 0, 1, 1], [], []>} : vector<8x256xbf16>, vector<256x128xbf16>, vector<8x128xf32> -> vector<8x128xf32>
    %129 = arith.addf %119, %128 : vector<8x128xf32>
    %c6_137 = arith.constant 6 : index
    %c1_138 = arith.constant 1 : index
    %c0_139 = arith.constant 0 : index
    %c0_140 = arith.constant 0 : index
    %130 = vector.load %arg2[%c6_137, %c1_138, %c0_139, %c0_140] : memref<8x2x41x256xbf16, #tpu.memory_space<vmem>>, vector<1x1x41x256xbf16>
    %131 = vector.shape_cast %130 : vector<1x1x41x256xbf16> to vector<41x256xbf16>
    %cst_141 = arith.constant dense<0.000000e+00> : vector<8x256xf32>
    %132 = tpu.matmul %0, %131, %cst_141 {dimension_numbers = #tpu.dot_dimension_numbers<[1], [0], [0], [1], [0, 0, 1, 1], [], []>} : vector<8x41xbf16>, vector<41x256xbf16>, vector<8x256xf32> -> vector<8x256xf32>
    %cst_142 = arith.constant 0.000000e+00 : f32
    %133 = vector.broadcast %cst_142 : f32 to vector<8x256xf32>
    %134 = arith.maximumf %132, %133 : vector<8x256xf32>
    %135 = arith.truncf %134 : vector<8x256xf32> to vector<8x256xbf16>
    %c6_143 = arith.constant 6 : index
    %c1_144 = arith.constant 1 : index
    %c0_145 = arith.constant 0 : index
    %c0_146 = arith.constant 0 : index
    %136 = vector.load %arg3[%c6_143, %c1_144, %c0_145, %c0_146] : memref<8x2x256x128xbf16, #tpu.memory_space<vmem>>, vector<1x1x256x128xbf16>
    %137 = vector.shape_cast %136 : vector<1x1x256x128xbf16> to vector<256x128xbf16>
    %cst_147 = arith.constant dense<0.000000e+00> : vector<8x128xf32>
    %138 = tpu.matmul %135, %137, %cst_147 {dimension_numbers = #tpu.dot_dimension_numbers<[1], [0], [0], [1], [0, 0, 1, 1], [], []>} : vector<8x256xbf16>, vector<256x128xbf16>, vector<8x128xf32> -> vector<8x128xf32>
    %139 = arith.addf %129, %138 : vector<8x128xf32>
    %c7 = arith.constant 7 : index
    %c0_148 = arith.constant 0 : index
    %c0_149 = arith.constant 0 : index
    %c0_150 = arith.constant 0 : index
    %140 = vector.load %arg2[%c7, %c0_148, %c0_149, %c0_150] : memref<8x2x41x256xbf16, #tpu.memory_space<vmem>>, vector<1x1x41x256xbf16>
    %141 = vector.shape_cast %140 : vector<1x1x41x256xbf16> to vector<41x256xbf16>
    %cst_151 = arith.constant dense<0.000000e+00> : vector<8x256xf32>
    %142 = tpu.matmul %0, %141, %cst_151 {dimension_numbers = #tpu.dot_dimension_numbers<[1], [0], [0], [1], [0, 0, 1, 1], [], []>} : vector<8x41xbf16>, vector<41x256xbf16>, vector<8x256xf32> -> vector<8x256xf32>
    %cst_152 = arith.constant 0.000000e+00 : f32
    %143 = vector.broadcast %cst_152 : f32 to vector<8x256xf32>
    %144 = arith.maximumf %142, %143 : vector<8x256xf32>
    %145 = arith.truncf %144 : vector<8x256xf32> to vector<8x256xbf16>
    %c7_153 = arith.constant 7 : index
    %c0_154 = arith.constant 0 : index
    %c0_155 = arith.constant 0 : index
    %c0_156 = arith.constant 0 : index
    %146 = vector.load %arg3[%c7_153, %c0_154, %c0_155, %c0_156] : memref<8x2x256x128xbf16, #tpu.memory_space<vmem>>, vector<1x1x256x128xbf16>
    %147 = vector.shape_cast %146 : vector<1x1x256x128xbf16> to vector<256x128xbf16>
    %cst_157 = arith.constant dense<0.000000e+00> : vector<8x128xf32>
    %148 = tpu.matmul %145, %147, %cst_157 {dimension_numbers = #tpu.dot_dimension_numbers<[1], [0], [0], [1], [0, 0, 1, 1], [], []>} : vector<8x256xbf16>, vector<256x128xbf16>, vector<8x128xf32> -> vector<8x128xf32>
    %149 = arith.addf %139, %148 : vector<8x128xf32>
    %c7_158 = arith.constant 7 : index
    %c1_159 = arith.constant 1 : index
    %c0_160 = arith.constant 0 : index
    %c0_161 = arith.constant 0 : index
    %150 = vector.load %arg2[%c7_158, %c1_159, %c0_160, %c0_161] : memref<8x2x41x256xbf16, #tpu.memory_space<vmem>>, vector<1x1x41x256xbf16>
    %151 = vector.shape_cast %150 : vector<1x1x41x256xbf16> to vector<41x256xbf16>
    %cst_162 = arith.constant dense<0.000000e+00> : vector<8x256xf32>
    %152 = tpu.matmul %0, %151, %cst_162 {dimension_numbers = #tpu.dot_dimension_numbers<[1], [0], [0], [1], [0, 0, 1, 1], [], []>} : vector<8x41xbf16>, vector<41x256xbf16>, vector<8x256xf32> -> vector<8x256xf32>
    %cst_163 = arith.constant 0.000000e+00 : f32
    %153 = vector.broadcast %cst_163 : f32 to vector<8x256xf32>
    %154 = arith.maximumf %152, %153 : vector<8x256xf32>
    %155 = arith.truncf %154 : vector<8x256xf32> to vector<8x256xbf16>
    %c7_164 = arith.constant 7 : index
    %c1_165 = arith.constant 1 : index
    %c0_166 = arith.constant 0 : index
    %c0_167 = arith.constant 0 : index
    %156 = vector.load %arg3[%c7_164, %c1_165, %c0_166, %c0_167] : memref<8x2x256x128xbf16, #tpu.memory_space<vmem>>, vector<1x1x256x128xbf16>
    %157 = vector.shape_cast %156 : vector<1x1x256x128xbf16> to vector<256x128xbf16>
    %cst_168 = arith.constant dense<0.000000e+00> : vector<8x128xf32>
    %158 = tpu.matmul %155, %157, %cst_168 {dimension_numbers = #tpu.dot_dimension_numbers<[1], [0], [0], [1], [0, 0, 1, 1], [], []>} : vector<8x256xbf16>, vector<256x128xbf16>, vector<8x128xf32> -> vector<8x128xf32>
    %159 = arith.addf %149, %158 : vector<8x128xf32>
    %c0_169 = arith.constant 0 : index
    %c0_170 = arith.constant 0 : index
    %160 = vector.load %arg4[%c0_169, %c0_170] : memref<1x128xf32, #tpu.memory_space<vmem>>, vector<1x128xf32>
    %161 = vector.broadcast %160 : vector<1x128xf32> to vector<8x128xf32>
    %162 = arith.addf %159, %161 : vector<8x128xf32>
    %cst_171 = arith.constant 0.000000e+00 : f32
    %163 = vector.broadcast %cst_171 : f32 to vector<8x128xf32>
    %164 = arith.maximumf %162, %163 : vector<8x128xf32>
    %165 = arith.truncf %164 : vector<8x128xf32> to vector<8x128xbf16>
    %c0_172 = arith.constant 0 : index
    %c0_173 = arith.constant 0 : index
    %166 = vector.load %arg5[%c0_172, %c0_173] : memref<128x128xbf16, #tpu.memory_space<vmem>>, vector<128x128xbf16>
    %cst_174 = arith.constant dense<0.000000e+00> : vector<8x128xf32>
    %167 = tpu.matmul %165, %166, %cst_174 {dimension_numbers = #tpu.dot_dimension_numbers<[1], [0], [0], [1], [0, 0, 1, 1], [], []>} : vector<8x128xbf16>, vector<128x128xbf16>, vector<8x128xf32> -> vector<8x128xf32>
    %c0_175 = arith.constant 0 : index
    %c0_176 = arith.constant 0 : index
    %168 = vector.load %arg6[%c0_175, %c0_176] : memref<1x128xf32, #tpu.memory_space<vmem>>, vector<1x128xf32>
    %169 = vector.broadcast %168 : vector<1x128xf32> to vector<8x128xf32>
    %170 = arith.addf %167, %169 : vector<8x128xf32>
    %c0_177 = arith.constant 0 : index
    %c0_178 = arith.constant 0 : index
    %171 = vector.load %arg7[%c0_177, %c0_178] : memref<8x128xf32, #tpu.memory_space<vmem>>, vector<8x128xf32>
    %172 = arith.negf %170 : vector<8x128xf32>
    %173 = math.exp %172 : vector<8x128xf32>
    %cst_179 = arith.constant 1.000000e+00 : f32
    %174 = vector.broadcast %cst_179 : f32 to vector<8x128xf32>
    %175 = arith.addf %174, %173 : vector<8x128xf32>
    %176 = arith.divf %174, %175 : vector<8x128xf32>
    %cst_180 = arith.constant 5.000000e-02 : f32
    %177 = vector.broadcast %cst_180 : f32 to vector<8x128xf32>
    %178 = arith.mulf %177, %171 : vector<8x128xf32>
    %179 = arith.addf %176, %178 : vector<8x128xf32>
    %180 = arith.mulf %171, %171 : vector<8x128xf32>
    %cst_181 = arith.constant dense<0.000000e+00> : vector<8xf32>
    %181 = vector.multi_reduction <add>, %180, %cst_181 [1] : vector<8x128xf32> to vector<8xf32>
    %182 = vector.shape_cast %181 : vector<8xf32> to vector<8x1xf32>
    %cst_182 = arith.constant -5.000000e-01 : f32
    %183 = vector.broadcast %cst_182 : f32 to vector<8x1xf32>
    %184 = arith.mulf %183, %182 : vector<8x1xf32>
    %cst_183 = arith.constant 8.30717468 : f32
    %185 = vector.broadcast %cst_183 : f32 to vector<8x1xf32>
    %186 = arith.addf %184, %185 : vector<8x1xf32>
    %187 = tpu.iota {dimensions = array<i32: 1>} : vector<8x128xi32>
    %c4_i32 = arith.constant 4 : i32
    %188 = vector.broadcast %c4_i32 : i32 to vector<8x128xi32>
    %189 = arith.cmpi slt, %187, %188 : vector<8x128xi32>
    %c64_i32 = arith.constant 64 : i32
    %190 = vector.broadcast %c64_i32 : i32 to vector<8x128xi32>
    %191 = arith.cmpi sge, %187, %190 : vector<8x128xi32>
    %c68_i32 = arith.constant 68 : i32
    %192 = vector.broadcast %c68_i32 : i32 to vector<8x128xi32>
    %193 = arith.cmpi slt, %187, %192 : vector<8x128xi32>
    %194 = arith.andi %191, %193 : vector<8x128xi1>
    %195 = arith.ori %189, %194 : vector<8x128xi1>
    %196 = arith.select %195, %179, %170 : vector<8x128xi1>, vector<8x128xf32>
    %c5_i32 = arith.constant 5 : i32
    %197 = vector.broadcast %c5_i32 : i32 to vector<8x128xi32>
    %198 = arith.cmpi eq, %187, %197 : vector<8x128xi32>
    %199 = vector.shape_cast %186 : vector<8x1xf32> to vector<8x1xf32>
    %200 = vector.broadcast %199 : vector<8x1xf32> to vector<8x128xf32>
    %201 = arith.select %198, %200, %196 : vector<8x128xi1>, vector<8x128xf32>
    %c0_184 = arith.constant 0 : index
    %c0_185 = arith.constant 0 : index
    %202 = vector.load %arg8[%c0_184, %c0_185] : memref<8x128xf32, #tpu.memory_space<vmem>>, vector<8x128xf32>
    tpu.vector_store %arg8[%c0_184, %c0_185], %201 {strides = array<i32>} : memref<8x128xf32, #tpu.memory_space<vmem>>, vector<8x128xf32>,
    return
  }
  func.func @transform_0(%arg0: i32) -> (i32, i32) {
    %c0_i32 = arith.constant 0 : i32
    %c0_i32_0 = arith.constant 0 : i32
    return %arg0, %c0_i32 : i32, i32
  }
  func.func @transform_1(%arg0: i32) -> (i32, i32, i32, i32) {
    %c0_i32 = arith.constant 0 : i32
    %c0_i32_0 = arith.constant 0 : i32
    %c0_i32_1 = arith.constant 0 : i32
    %c0_i32_2 = arith.constant 0 : i32
    %c0_i32_3 = arith.constant 0 : i32
    return %c0_i32, %c0_i32_0, %c0_i32_1, %c0_i32_2 : i32, i32, i32, i32
  }
  func.func @transform_2(%arg0: i32) -> (i32, i32, i32, i32) {
    %c0_i32 = arith.constant 0 : i32
    %c0_i32_0 = arith.constant 0 : i32
    %c0_i32_1 = arith.constant 0 : i32
    %c0_i32_2 = arith.constant 0 : i32
    %c0_i32_3 = arith.constant 0 : i32
    return %c0_i32, %c0_i32_0, %c0_i32_1, %c0_i32_2 : i32, i32, i32, i32
  }
  func.func @transform_3(%arg0: i32) -> (i32, i32) {
    %c0_i32 = arith.constant 0 : i32
    %c0_i32_0 = arith.constant 0 : i32
    %c0_i32_1 = arith.constant 0 : i32
    return %c0_i32, %c0_i32_0 : i32, i32
  }
  func.func @transform_4(%arg0: i32) -> (i32, i32) {
    %c0_i32 = arith.constant 0 : i32
    %c0_i32_0 = arith.constant 0 : i32
    %c0_i32_1 = arith.constant 0 : i32
    return %c0_i32, %c0_i32_0 : i32, i32
  }
  func.func @transform_5(%arg0: i32) -> (i32, i32) {
    %c0_i32 = arith.constant 0 : i32
    %c0_i32_0 = arith.constant 0 : i32
    %c0_i32_1 = arith.constant 0 : i32
    return %c0_i32, %c0_i32_0 : i32, i32
  }
  func.func @transform_6(%arg0: i32) -> (i32, i32) {
    %c0_i32 = arith.constant 0 : i32
    %c0_i32_0 = arith.constant 0 : i32
    return %arg0, %c0_i32 : i32, i32
  }
  func.func @transform_7(%arg0: i32) -> (i32, i32) {
    %c0_i32 = arith.constant 0 : i32
    %c0_i32_0 = arith.constant 0 : i32
    return %arg0, %c0_i32 : i32, i32
  }
}

</mosaic_0001>

<bundles_post_ra>
// kernel: tpu_custom_call.1
= control target key start
LH: loop header
LB: loop body
LE: loop exit
PB: predicated region body
PF: predicated region fallthrough
CT: control target
= control target key end

     0   :  { %12 = vsyncpa [#allocation3], 0  ;;  %s6128_s0 = inlined_call_operand.vmem [shape: bf16[8,41], index: 0, kind: input, shape index: {}]   ;;  %s6129_s1 = inlined_call_operand.vmem [shape: bf16[8,2,41,256], index: 1, kind: input, shape index: {}]   ;;  %s6130_s2 = inlined_call_operand.hbm [shape: bf16[8,2,256,128], index: 2, kind: input, shape index: {}]   ;;  %s6131_s3 = inlined_call_operand.vmem [shape: f32[1,128], index: 3, kind: input, shape index: {}]   ;;  %s6132_s4 = inlined_call_operand.vmem [shape: bf16[128,128], index: 4, kind: input, shape index: {}]   ;;  %s6133_s5 = inlined_call_operand.vmem [shape: f32[1,128], index: 5, kind: input, shape index: {}]   ;;  %s6134_s6 = inlined_call_operand.vmem [shape: f32[8,128], index: 6, kind: input, shape index: {}]   ;;  %s6135_s7 = inlined_call_operand.hbm [shape: f32[8,128], index: 7, kind: output, shape index: {}]  }
   0x1   :  { %13 = vsyncpa [#allocation4], 0  ;;  %s5624_s24 = smov [#allocation2]   ;;  %s5576_s28 = scalar_lea.hbm %s6130_s2, 32768 }
   0x2   :  { %s23_s25 = sshll.u32 %s5624_s24, 4  ;;  %p5577_p0 = scmp.ne.s32.totalorder %s6130_s2, %s5576_s28  ;;  %s24_s25 = int_to_ptr.vmem [resolvable:$true] %s23_s25 }
   0x3   :  { %p5580_p1 = scmp.lt.u32.totalorder %s5576_s28, %s6130_s2 }
   0x5   :  { %p5582_p2 = pnand %p5580_p1, %p5577_p0 }
   0x7   :  { %5585 = shalt.err (!%p5582_p2)
}
   0x8   :  { %s5586_s10 = scalar_lea.vmem %s24_s25, 32768  ;;  %p5591_p4 = scmp.lt.s32.totalorder %s24_s25, %s24_s25 }
   0x9   :  { %p5587_p3 = scmp.ne.s32.totalorder %s24_s25, %s5586_s10  ;;  %p5592_p5 = scmp.lt.s32.totalorder %s5586_s10, %s5586_s10 }
   0xb   :  { %p5593_p6 = por %p5592_p5, %p5591_p4 }
   0xd   :  { %p5594_p7 = pnand %p5593_p6, %p5587_p3 }
   0xf   :  { %5597 = shalt.err (!%p5594_p7)
}
  0x10   :  { %s5625_s11 = smov 64   ;;  %s5626_s12 = smov 4  }
  0x11   :  { %29 = dma.hbm_to_vmem [thread:$0]  %s6130_s2, 32768, %s24_s25, [#allocation3], %s5625_s11, %s5625_s11, %s5626_s12  }
  0x12   :  { %5620 = dma.done.wait [#allocation3], 32768  }
  0x13   :  { %5621 = vsyncadd [#allocation3], 4294934528  ;;  %v5627_v0 = vmov 0   ;;  %vm81_vm0 = vcmask 1043456   ;;  %v5162_v1 = vld [vmem:[%s6129_s1 + $0x4] ss:$8 sps:$4 sm:$0xff]  }
  0x14   :  { %123 = vmatprep.mubr.bf16.mxu0 %v5627_v0  ;;  %241 = vmatprep.mubr.bf16.mxu1 %v5627_v0  ;;  %v5164_v2 = vld [vmem:[%s6129_s1 + $0x34] ss:$8 sps:$4 sm:$0xff]   ;;  %vm82_vm1 = vcmask 1044480   ;;  %v5166_v3 = vld [vmem:[%s6129_s1] ss:$8 sps:$4 sm:$0xff]   ;;  %v5628_v5 = vmov 65535  }
  0x15   :  { %91 = vmatprep.subr.bf16.mxu0 %v5162_v1  ;;  %v5167_v4 = vld [vmem:[%s6129_s1 + $0x30] ss:$8 sps:$4 sm:$0xff]   ;;  %v83_v6 = vsel %vm81_vm0, 4294967295, %v5628_v5  ;;  %209 = vmatprep.subr.bf16.mxu1 %v5164_v2  ;;  %v5168_v7 = vld [vmem:[%s6129_s1 + $0x14] ss:$8 sps:$4 sm:$0xff]   ;;  %v5180_v17 = vld [vmem:[#allocation2 + $0xc0] sm:$0xff]  }
  0x16   :  { %92 = vmatpush1.bf16.msra.mxu0 %v5166_v3  ;;  %210 = vmatpush1.bf16.msra.mxu1 %v5167_v4  ;;  %v5170_v8 = vld [vmem:[%s6129_s1 + $0x44] ss:$8 sps:$4 sm:$0xff]   ;;  %v5172_v9 = vld [vmem:[%s6129_s1 + $0x10] ss:$8 sps:$4 sm:$0xff]   ;;  %v5173_v10 = vld [vmem:[%s6129_s1 + $0x40] ss:$8 sps:$4 sm:$0xff]  }
  0x17   :  { %93 = vmatprep.subr.bf16.mxu0 %v5168_v7  ;;  %v5710_v11 = vsel %vm82_vm1, %v83_v6, 0  ;;  %211 = vmatprep.subr.bf16.mxu1 %v5170_v8  ;;  %v5174_v12 = vld [vmem:[%s6129_s1 + $0x24] ss:$8 sps:$4 sm:$0x1f]   ;;  %v42_v21 = vld [vmem:[%s6128_s0] sm:$0xf] }
  0x18   :  { %v5176_v13 = vld [vmem:[%s6129_s1 + $0x54] ss:$8 sps:$4 sm:$0x1f]   ;;  %v5178_v14 = vld [vmem:[%s6129_s1 + $0x20] ss:$8 sps:$4 sm:$0x1f]   ;;  %v89_v15 = vand.u32 %v5174_v12, %v5710_v11 }
  0x19   :  { %v5179_v16 = vld [vmem:[%s6129_s1 + $0x50] ss:$8 sps:$4 sm:$0x1f]   ;;  %v207_v18 = vand.u32 %v5176_v13, %v5710_v11  ;;  %v86_v19 = vand.u32 %v5178_v14, %v5710_v11  ;;  %v5181_v22 = vld [vmem:[#allocation2 + $0x80] sm:$0xff]   ;;  %vm77_vm2 = vcmask 334848   ;;  %v5184_v25 = vld [vmem:[#allocation2 + $0xc8] sm:$0xff]  }
  0x1a   :  { %94 = vmatpush1.bf16.msra.mxu0 %v5172_v9  ;;  %212 = vmatpush1.bf16.msra.mxu1 %v5173_v10  ;;  %v204_v20 = vand.u32 %v5179_v16, %v5710_v11  ;;  %v5182_v23 = vld [vmem:[#allocation2 + $0x40] sm:$0xff]   ;;  %v5185_v26 = vld [vmem:[#allocation2 + $0x88] sm:$0xff]   ;;  %v5188_v29 = vld [vmem:[#allocation2 + $0xd0] sm:$0xff]   ;;  %vm5630_vm3 = vmmov 0  }
  0x1b   :  { %95 = vmatprep.subr.bf16.mxu0 %v89_v15  ;;  %213 = vmatprep.subr.bf16.mxu1 %v207_v18  ;;  %v5183_v24 = vld [vmem:[#allocation2] sm:$0xff]   ;;  %v5186_v27 = vld [vmem:[#allocation2 + $0x48] sm:$0xff]   ;;  %v5189_v30 = vld [vmem:[#allocation2 + $0x90] sm:$0xff]  }
  0x1c   :  { %v5187_v28 = vld [vmem:[#allocation2 + $0x8] sm:$0xff]   ;;  %v5190_v31 = vld [vmem:[#allocation2 + $0x50] sm:$0xff]   ;;  %v5192_v33 = vld [vmem:[#allocation2 + $0xd8] sm:$0xff]  }
  0x1d   :  { %v5191_v32 = vld [vmem:[#allocation2 + $0x10] sm:$0xff]   ;;  %v5193_v34 = vld [vmem:[#allocation2 + $0x98] sm:$0xff]   ;;  %v5196_v37 = vld [vmem:[#allocation2 + $0xe0] sm:$0xff]  }
  0x1e   :  { %96 = vmatpush1.bf16.msra.mxu0 %v86_v19  ;;  %214 = vmatpush1.bf16.msra.mxu1 %v204_v20  ;;  %v5194_v35 = vld [vmem:[#allocation2 + $0x58] sm:$0xff]   ;;  %v5197_v38 = vld [vmem:[#allocation2 + $0xa0] sm:$0xff]   ;;  %v5200_v41 = vld [vmem:[#allocation2 + $0xe8] sm:$0xff]  }
  0x1f   :  { %4773 = vmatprep.subr.bf16.mxu0 %v5180_v17  ;;  %4795 = vmatprep.subr.bf16.mxu1 %v5182_v23  ;;  %v5195_v36 = vld [vmem:[#allocation2 + $0x18] sm:$0xff]   ;;  %v5198_v39 = vld [vmem:[#allocation2 + $0x60] sm:$0xff]   ;;  %v5201_v42 = vld [vmem:[#allocation2 + $0xa8] sm:$0xff]  }
  0x20   :  { %v5199_v40 = vld [vmem:[#allocation2 + $0x20] sm:$0xff]   ;;  %v5202_v43 = vld [vmem:[#allocation2 + $0x68] sm:$0xff]   ;;  %v5204_v45 = vld [vmem:[#allocation2 + $0xf0] sm:$0xff]  }
  0x21   :  { %4310 = vmatmul.mubr.msk.bf16.vlgmr.msra.gmra.mrb[0].mxu0 %vm77_vm2, %v42_v21  ;;  %4323 = vmatmul.mubr.msk.bf16.vlgmr.msra.gmra.mrb[0].mxu1 %vm77_vm2, %v42_v21  ;;  %v5203_v44 = vld [vmem:[#allocation2 + $0x28] sm:$0xff]   ;;  %v5205_v46 = vld [vmem:[#allocation2 + $0xb0] sm:$0xff]   ;;  %v5208_v49 = vld [vmem:[#allocation2 + $0xf8] sm:$0xff]  }
  0x22   :  { %4774 = vmatpush3.bf16.msra.mxu0 %v5181_v22  ;;  %4796 = vmatpush3.bf16.msra.mxu1 %v5183_v24  ;;  %v5206_v47 = vld [vmem:[#allocation2 + $0x70] sm:$0xff]   ;;  %v5209_v50 = vld [vmem:[#allocation2 + $0xb8] sm:$0xff]   ;;  %v5214_v53 = vld [vmem:[%s6129_s1 + $0x64] ss:$8 sps:$4 sm:$0xff]  }
  0x23   :  { %4775 = vmatprep.subr.bf16.mxu0 %v5184_v25  ;;  %4797 = vmatprep.subr.bf16.mxu1 %v5186_v27  ;;  %v5207_v48 = vld [vmem:[#allocation2 + $0x30] sm:$0xff]   ;;  %v5210_v51 = vld [vmem:[#allocation2 + $0x78] sm:$0xff]   ;;  %v5230_v54 = vld [vmem:[#allocation2 + $0x140] sm:$0xff]  }
  0x24   :  { %v5211_v52 = vld [vmem:[#allocation2 + $0x38] sm:$0xff]   ;;  %v5212_v1 = vld [vmem:[%s6129_s1 + $0x60] ss:$8 sps:$4 sm:$0xff]   ;;  %v5220_v6 = vld [vmem:[%s6129_s1 + $0x84] ss:$8 sps:$4 sm:$0x1f]  }
  0x25   :  { %v5217_v5 = vld [vmem:[%s6129_s1 + $0x74] ss:$8 sps:$4 sm:$0xff]   ;;  %v5231_v8 = vld [vmem:[#allocation2 + $0x100] sm:$0xff]   ;;  %v5232_v13 = vld [vmem:[#allocation2 + $0x148] sm:$0xff]   ;;  %v598_v16 = vand.u32 %v5220_v6, %v5710_v11 }
  0x26   :  { %4776 = vmatpush3.bf16.msra.mxu0 %v5185_v26  ;;  %4798 = vmatpush3.bf16.msra.mxu1 %v5187_v28  ;;  %v5215_v14 = vld [vmem:[%s6129_s1 + $0x70] ss:$8 sps:$4 sm:$0xff]   ;;  %v5218_v15 = vld [vmem:[%s6129_s1 + $0x80] ss:$8 sps:$4 sm:$0x1f]  }
  0x27   :  { %4777 = vmatprep.subr.bf16.mxu0 %v5188_v29  ;;  %4799 = vmatprep.subr.bf16.mxu1 %v5190_v31  ;;  %v5233_v17 = vld [vmem:[#allocation2 + $0x108] sm:$0xff]   ;;  %v5234_v18 = vld [vmem:[#allocation2 + $0x150] sm:$0xff]   ;;  %v595_v19 = vand.u32 %v5218_v15, %v5710_v11  ;;  %v5236_v22 = vld [vmem:[#allocation2 + $0x158] sm:$0xff]  }
  0x28   :  { %v5223_v20 = vld [vmem:[%s6129_s1 + $0x94] ss:$8 sps:$4 sm:$0xff]   ;;  %v5221_v23 = vld [vmem:[%s6129_s1 + $0x90] ss:$8 sps:$4 sm:$0xff]   ;;  %v5226_v24 = vld [vmem:[%s6129_s1 + $0xa4] ss:$8 sps:$4 sm:$0xff]  }
  0x29   :  { %v5235_v21 = vld [vmem:[#allocation2 + $0x110] sm:$0xff]   ;;  %v5238_v26 = vld [vmem:[#allocation2 + $0x118] sm:$0xff]   ;;  %v5769_v27 = vld [vmem:[%s6128_s0] sm:$0xf] }
  0x2a   :  { %4778 = vmatpush3.bf16.msra.mxu0 %v5189_v30  ;;  %4800 = vmatpush3.bf16.msra.mxu1 %v5191_v32  ;;  %v5229_v25 = vld [vmem:[%s6129_s1 + $0xb4] ss:$8 sps:$4 sm:$0x1f]   ;;  %v5224_v28 = vld [vmem:[%s6129_s1 + $0xa0] ss:$8 sps:$4 sm:$0xff]  }
  0x2b   :  { %4779 = vmatprep.subr.bf16.mxu0 %v5192_v33  ;;  %4801 = vmatprep.subr.bf16.mxu1 %v5194_v35  ;;  %v5227_v29 = vld [vmem:[%s6129_s1 + $0xb0] ss:$8 sps:$4 sm:$0x1f]   ;;  %v854_v30 = vand.u32 %v5229_v25, %v5710_v11  ;;  %v5237_v32 = vld [vmem:[#allocation2 + $0x1c0] sm:$0xff]   ;;  %v5241_v35 = vld [vmem:[#allocation2 + $0x1c8] sm:$0xff]  }
  0x2c   :  { %v851_v31 = vand.u32 %v5227_v29, %v5710_v11  ;;  %v5239_v33 = vld [vmem:[#allocation2 + $0x180] sm:$0xff]  }
  0x2d   :  { %v5257_v15 = vld [vmem:[%s6129_s1 + $0xc0] ss:$8 sps:$4 sm:$0xff]  }
  0x2e   :  { %4780 = vmatpush3.bf16.msra.mxu0 %v5193_v34  ;;  %4802 = vmatpush3.bf16.msra.mxu1 %v5195_v36  ;;  %v5240_v34 = vld [vmem:[#allocation2 + $0x160] sm:$0xff]  }
  0x2f   :  { %4781 = vmatprep.subr.bf16.mxu0 %v5196_v37  ;;  %4803 = vmatprep.subr.bf16.mxu1 %v5198_v39  ;;  %v5242_v36 = vld [vmem:[#allocation2 + $0x120] sm:$0xff]   ;;  %v5243_v37 = vld [vmem:[#allocation2 + $0x188] sm:$0xff]   ;;  %v5245_v39 = vld [vmem:[#allocation2 + $0x1d0] sm:$0xff]  }
  0x30   :  { %v5280_v25 = vld [vmem:[#allocation2 + $0x240] sm:$0xff]  }
  0x32   :  { %4782 = vmatpush3.bf16.msra.mxu0 %v5197_v38  ;;  %4804 = vmatpush3.bf16.msra.mxu1 %v5199_v40  ;;  %v5244_v38 = vld [vmem:[#allocation2 + $0x168] sm:$0xff]  }
  0x33   :  { %4783 = vmatprep.subr.bf16.mxu0 %v5200_v41  ;;  %4805 = vmatprep.subr.bf16.mxu1 %v5202_v43  ;;  %v5246_v40 = vld [vmem:[#allocation2 + $0x128] sm:$0xff]   ;;  %v5247_v41 = vld [vmem:[#allocation2 + $0x190] sm:$0xff]   ;;  %v5249_v43 = vld [vmem:[#allocation2 + $0x1d8] sm:$0xff]  }
  0x36   :  { %4784 = vmatpush3.bf16.msra.mxu0 %v5201_v42  ;;  %4806 = vmatpush3.bf16.msra.mxu1 %v5203_v44  ;;  %v5248_v42 = vld [vmem:[#allocation2 + $0x170] sm:$0xff]  }
  0x37   :  { %4785 = vmatprep.subr.bf16.mxu0 %v5204_v45  ;;  %4807 = vmatprep.subr.bf16.mxu1 %v5206_v47  ;;  %v5250_v44 = vld [vmem:[#allocation2 + $0x130] sm:$0xff]   ;;  %v5251_v45 = vld [vmem:[#allocation2 + $0x198] sm:$0xff]   ;;  %v5253_v47 = vld [vmem:[#allocation2 + $0x1e0] sm:$0xff]  }
  0x3a   :  { %4786 = vmatpush3.bf16.msra.mxu0 %v5205_v46  ;;  %4808 = vmatpush3.bf16.msra.mxu1 %v5207_v48  ;;  %v5252_v46 = vld [vmem:[#allocation2 + $0x178] sm:$0xff]  }
  0x3b   :  { %4787 = vmatprep.subr.bf16.mxu0 %v5208_v49  ;;  %4809 = vmatprep.subr.bf16.mxu1 %v5210_v51  ;;  %v5254_v48 = vld [vmem:[#allocation2 + $0x138] sm:$0xff]   ;;  %v5255_v49 = vld [vmem:[#allocation2 + $0x1a0] sm:$0xff]  }
  0x3c   :  { %v5259_v51 = vld [vmem:[%s6129_s1 + $0xc4] ss:$8 sps:$4 sm:$0xff]  }
  0x3e   :  { %4788 = vmatpush3.bf16.msra.mxu0 %v5209_v50  ;;  %4810 = vmatpush3.bf16.msra.mxu1 %v5211_v52  ;;  %v5256_v50 = vld [vmem:[#allocation2 + $0x1e8] sm:$0xff]  }
  0x3f   :  { %600 = vmatprep.subr.bf16.mxu0 %v5214_v53  ;;  %4817 = vmatprep.subr.bf16.mxu1 %v5230_v54  ;;  %v5260_v52 = vld [vmem:[#allocation2 + $0x1a8] sm:$0xff]   ;;  %v5261_v53 = vld [vmem:[#allocation2 + $0x1f0] sm:$0xff]  }
  0x40   :  { %v5265_v54 = vld [vmem:[#allocation2 + $0x1b0] sm:$0xff]  }
  0xf4   :  { %v125_v55 = vpop.f32.mrb[0].mxu0  ;;  %v243_v56 = vpop.f32.mrb[0].mxu1 }
  0xf5   :  { %v132_v57 = vmax.f32 %v125_v55, 0.0  ;;  %v250_v58 = vmax.f32 %v243_v56, 0.0  ;;  %v127_v59 = vpop.f32.mrb[1].mxu0  ;;  %v245_v60 = vpop.f32.mrb[1].mxu1  ;;  %v5266_v55 = vld [vmem:[#allocation2 + $0x1f8] sm:$0xff]  }
  0xf6   :  { %v133_v61 = vmax.f32 %v127_v59, 0.0  ;;  %v251_v62 = vmax.f32 %v245_v60, 0.0  ;;  %v247_v63 = vpop.f32.mrb[2].mxu1  ;;  %v129_v2 = vpop.f32.mrb[2].mxu0  ;;  %v5270_v56 = vld [vmem:[#allocation2 + $0x1b8] sm:$0xff]  }
  0xf7   :  { %v134_v3 = vpack.c.bf16 %v132_v57, %v132_v57  ;;  %v248_v4 = vpop.f32.mrb[3].mxu1  ;;  %v130_v7 = vpop.f32.mrb[3].mxu0  ;;  %v252_v12 = vpack.c.bf16 %v250_v58, %v250_v58  ;;  %v5273_v57 = vld [vmem:[%s6129_s1 + $0xf4] ss:$8 sps:$4 sm:$0xff]  }
  0xf8   :  { %v135_v9 = vpack.c.bf16 %v133_v61, %v133_v61  ;;  %v253_v10 = vpack.c.bf16 %v251_v62, %v251_v62 }
  0xfa   :  { %415 = vmatprep.mubr.bf16.mxu0 %v253_v10  ;;  %551 = vmatprep.mubr.bf16.mxu1 %v135_v9 }
  0xfb   :  { %416 = vmatmul.mubr.bf16.vlgmr.msra.gmra.mrb[4].mxu0 %v252_v12  ;;  %552 = vmatmul.mubr.bf16.vlgmr.msra.gmra.mrb[4].mxu1 %v134_v3 }
  0xfc   :  { %601 = vmatpush1.bf16.msra.mxu0 %v5212_v1  ;;  %632 = vmatprep.mubr.bf16.mxu0 %v5627_v0 }
  0xfd   :  { %602 = vmatprep.subr.bf16.mxu0 %v5217_v5  ;;  %4818 = vmatpush3.bf16.msra.mxu1 %v5231_v8 }
  0xfe   :  { %4819 = vmatprep.subr.bf16.mxu1 %v5232_v13 }
 0x100   :  { %603 = vmatpush1.bf16.msra.mxu0 %v5215_v14 }
 0x101   :  { %604 = vmatprep.subr.bf16.mxu0 %v598_v16  ;;  %4820 = vmatpush3.bf16.msra.mxu1 %v5233_v17  ;;  %v5264_v16 = vld [vmem:[%s6129_s1 + $0xd4] ss:$8 sps:$4 sm:$0xff]   ;;  %v5269_v17 = vld [vmem:[%s6129_s1 + $0xe4] ss:$8 sps:$4 sm:$0x1f]  }
 0x102   :  { %4821 = vmatprep.subr.bf16.mxu1 %v5234_v18  ;;  %v5262_v18 = vld [vmem:[%s6129_s1 + $0xd0] ss:$8 sps:$4 sm:$0xff]  }
 0x104   :  { %605 = vmatpush1.bf16.msra.mxu0 %v595_v19  ;;  %v5267_v19 = vld [vmem:[%s6129_s1 + $0xe0] ss:$8 sps:$4 sm:$0x1f]  }
 0x105   :  { %856 = vmatprep.subr.bf16.mxu0 %v5223_v20  ;;  %4822 = vmatpush3.bf16.msra.mxu1 %v5235_v21  ;;  %v1110_v20 = vand.u32 %v5269_v17, %v5710_v11 }
 0x106   :  { %4823 = vmatprep.subr.bf16.mxu1 %v5236_v22  ;;  %v1107_v22 = vand.u32 %v5267_v19, %v5710_v11 }
 0x107   :  { %4368 = vmatmul.mubr.msk.bf16.vlgmr.msra.gmra.mrb[8].mxu0 %vm77_vm2, %v5769_v27 }
 0x108   :  { %857 = vmatpush1.bf16.msra.mxu0 %v5221_v23  ;;  %888 = vmatprep.mubr.bf16.mxu0 %v5627_v0 }
 0x109   :  { %858 = vmatprep.subr.bf16.mxu0 %v5226_v24  ;;  %4824 = vmatpush3.bf16.msra.mxu1 %v5238_v26 }
 0x10a   :  { %4825 = vmatprep.subr.bf16.mxu1 %v5240_v34  ;;  %v5279_v34 = vld [vmem:[%s6129_s1 + $0x114] ss:$8 sps:$4 sm:$0x1f]  }
 0x10c   :  { %859 = vmatpush1.bf16.msra.mxu0 %v5224_v28 }
 0x10d   :  { %860 = vmatprep.subr.bf16.mxu0 %v854_v30  ;;  %4826 = vmatpush3.bf16.msra.mxu1 %v5242_v36  ;;  %v5282_v36 = vld [vmem:[#allocation2 + $0x248] sm:$0xff]  }
 0x10e   :  { %4827 = vmatprep.subr.bf16.mxu1 %v5244_v38  ;;  %v5277_v38 = vld [vmem:[%s6129_s1 + $0x110] ss:$8 sps:$4 sm:$0x1f]  }
 0x110   :  { %861 = vmatpush1.bf16.msra.mxu0 %v851_v31  ;;  %v5271_v31 = vld [vmem:[%s6129_s1 + $0xf0] ss:$8 sps:$4 sm:$0xff]  }
 0x111   :  { %4839 = vmatprep.subr.bf16.mxu0 %v5237_v32  ;;  %4828 = vmatpush3.bf16.msra.mxu1 %v5246_v40  ;;  %v5283_v40 = vld [vmem:[#allocation2 + $0x208] sm:$0xff]  }
 0x112   :  { %4829 = vmatprep.subr.bf16.mxu1 %v5248_v42  ;;  %v1363_v42 = vand.u32 %v5277_v38, %v5710_v11 }
 0x113   :  { %4397 = vmatmul.mubr.msk.bf16.vlgmr.msra.gmra.mrb[12].mxu0 %vm77_vm2, %v5769_v27 }
 0x114   :  { %4840 = vmatpush3.bf16.msra.mxu0 %v5239_v33  ;;  %v5276_v33 = vld [vmem:[%s6129_s1 + $0x104] ss:$8 sps:$4 sm:$0xff]  }
 0x115   :  { %4841 = vmatprep.subr.bf16.mxu0 %v5241_v35  ;;  %4830 = vmatpush3.bf16.msra.mxu1 %v5250_v44  ;;  %v5281_v35 = vld [vmem:[#allocation2 + $0x200] sm:$0xff]  }
 0x116   :  { %4831 = vmatprep.subr.bf16.mxu1 %v5252_v46  ;;  %v5287_v44 = vld [vmem:[#allocation2 + $0x2c0] sm:$0xff]  }
 0x117   :  { %v5289_v46 = vld [vmem:[#allocation2 + $0x280] sm:$0xff]  }
 0x118   :  { %4842 = vmatpush3.bf16.msra.mxu0 %v5243_v37  ;;  %v5274_v37 = vld [vmem:[%s6129_s1 + $0x100] ss:$8 sps:$4 sm:$0xff]  }
 0x119   :  { %4843 = vmatprep.subr.bf16.mxu0 %v5245_v39  ;;  %4832 = vmatpush3.bf16.msra.mxu1 %v5254_v48  ;;  %v1366_v39 = vand.u32 %v5279_v34, %v5710_v11  ;;  %v5290_v48 = vld [vmem:[#allocation2 + $0x260] sm:$0xff]   ;;  %v5312_v34 = vld [vmem:[%s6129_s1 + $0x130] ss:$8 sps:$4 sm:$0xff]  }
 0x11a   :  { %1112 = vmatprep.subr.bf16.mxu1 %v5259_v51  ;;  %v5293_v51 = vld [vmem:[#allocation2 + $0x288] sm:$0xff]  }
 0x11c   :  { %4844 = vmatpush3.bf16.msra.mxu0 %v5247_v41  ;;  %v5284_v41 = vld [vmem:[#allocation2 + $0x250] sm:$0xff]  }
 0x11d   :  { %4845 = vmatprep.subr.bf16.mxu0 %v5249_v43  ;;  %v5285_v43 = vld [vmem:[#allocation2 + $0x210] sm:$0xff]  }
 0x120   :  { %4846 = vmatpush3.bf16.msra.mxu0 %v5251_v45  ;;  %v5286_v45 = vld [vmem:[#allocation2 + $0x258] sm:$0xff]  }
 0x121   :  { %4847 = vmatprep.subr.bf16.mxu0 %v5253_v47  ;;  %v5288_v47 = vld [vmem:[#allocation2 + $0x218] sm:$0xff]  }
 0x124   :  { %4848 = vmatpush3.bf16.msra.mxu0 %v5255_v49  ;;  %v5291_v49 = vld [vmem:[#allocation2 + $0x2c8] sm:$0xff]  }
 0x125   :  { %4849 = vmatprep.subr.bf16.mxu0 %v5256_v50  ;;  %v5292_v50 = vld [vmem:[#allocation2 + $0x220] sm:$0xff]  }
 0x128   :  { %4850 = vmatpush3.bf16.msra.mxu0 %v5260_v52  ;;  %v5294_v52 = vld [vmem:[#allocation2 + $0x268] sm:$0xff]  }
 0x129   :  { %4851 = vmatprep.subr.bf16.mxu0 %v5261_v53  ;;  %v5295_v53 = vld [vmem:[#allocation2 + $0x2d0] sm:$0xff]  }
 0x12c   :  { %4852 = vmatpush3.bf16.msra.mxu0 %v5265_v54  ;;  %v5296_v54 = vld [vmem:[#allocation2 + $0x228] sm:$0xff]  }
 0x12d   :  { %4853 = vmatprep.subr.bf16.mxu0 %v5266_v55  ;;  %v5297_v55 = vld [vmem:[#allocation2 + $0x290] sm:$0xff]  }
 0x130   :  { %4854 = vmatpush3.bf16.msra.mxu0 %v5270_v56  ;;  %v5298_v56 = vld [vmem:[#allocation2 + $0x270] sm:$0xff]  }
 0x131   :  { %1368 = vmatprep.subr.bf16.mxu0 %v5273_v57  ;;  %v5299_v57 = vld [vmem:[#allocation2 + $0x2d8] sm:$0xff]  }
 0x1ce   :  { %v4789_v58 = vpop.f32.mrb[4].mxu0  ;;  %v4811_v59 = vpop.f32.mrb[4].mxu1 }
 0x1cf   :  { %v4790_v60 = vpop.f32.mrb[5].mxu0  ;;  %v4812_v61 = vpop.f32.mrb[5].mxu1 }
 0x1d0   :  { %v4791_v62 = vadd.f32 %v4790_v60, %v4789_v58  ;;  %v4813_v63 = vadd.f32 %v4812_v61, %v4811_v59  ;;  %v4792_v1 = vpop.f32.mrb[6].mxu0  ;;  %v4814_v2 = vpop.f32.mrb[6].mxu1  ;;  %v5300_v58 = vld [vmem:[#allocation2 + $0x230] sm:$0xff]   ;;  %v5301_v59 = vld [vmem:[#allocation2 + $0x298] sm:$0xff]   ;;  %v5303_v61 = vld [vmem:[#allocation2 + $0x2e0] sm:$0xff]  }
 0x1d1   :  { %v4793_v3 = vpop.f32.mrb[7].mxu0  ;;  %v4815_v4 = vpop.f32.mrb[7].mxu1  ;;  %v5302_v60 = vld [vmem:[#allocation2 + $0x278] sm:$0xff]   ;;  %v5306_v1 = vld [vmem:[#allocation2 + $0x2e8] sm:$0xff]  }
 0x1d2   :  { %v5790_v5 = vadd.f32 %v4813_v63, %v4791_v62  ;;  %v5304_v62 = vld [vmem:[#allocation2 + $0x238] sm:$0xff]   ;;  %v5305_v63 = vld [vmem:[#allocation2 + $0x2a0] sm:$0xff]   ;;  %v5310_v3 = vld [vmem:[#allocation2 + $0x2a8] sm:$0xff]  }
 0x1d3   :  { %v5309_v2 = vld [vmem:[%s6129_s1 + $0x124] ss:$8 sps:$4 sm:$0xff]   ;;  %v5311_v4 = vld [vmem:[#allocation2 + $0x2f0] sm:$0xff]  }
 0x1da   :  { %v634_v6 = vpop.f32.mrb[8].mxu0 }
 0x1db   :  { %v641_v7 = vmax.f32 %v634_v6, 0.0  ;;  %v636_v8 = vpop.f32.mrb[9].mxu0  ;;  %v5315_v6 = vld [vmem:[#allocation2 + $0x2b0] sm:$0xff]  }
 0x1dc   :  { %v642_v9 = vmax.f32 %v636_v8, 0.0  ;;  %v638_v10 = vpop.f32.mrb[10].mxu0  ;;  %v5320_v8 = vld [vmem:[#allocation2 + $0x2b8] sm:$0xff]  }
 0x1dd   :  { %v643_v12 = vpack.c.bf16 %v641_v7, %v641_v7  ;;  %v639_v13 = vpop.f32.mrb[11].mxu0  ;;  %v5316_v7 = vld [vmem:[#allocation2 + $0x2f8] sm:$0xff]  }
 0x1de   :  { %v644_v14 = vpack.c.bf16 %v642_v9, %v642_v9  ;;  %v5323_v9 = vld [vmem:[%s6129_s1 + $0x154] ss:$8 sps:$4 sm:$0xff]  }
 0x1e0   :  { %806 = vmatprep.mubr.bf16.mxu1 %v644_v14 }
 0x1e1   :  { %807 = vmatmul.mubr.bf16.vlgmr.msra.gmra.mrb[8].mxu1 %v643_v12 }
 0x1e2   :  { %1113 = vmatpush1.bf16.msra.mxu1 %v5257_v15  ;;  %1144 = vmatprep.mubr.bf16.mxu1 %v5627_v0 }
 0x1e3   :  { %1114 = vmatprep.subr.bf16.mxu1 %v5264_v16 }
 0x1e6   :  { %1115 = vmatpush1.bf16.msra.mxu1 %v5262_v18  ;;  %v890_v21 = vpop.f32.mrb[12].mxu0 }
 0x1e7   :  { %v897_v23 = vmax.f32 %v890_v21, 0.0  ;;  %v892_v24 = vpop.f32.mrb[13].mxu0  ;;  %1116 = vmatprep.subr.bf16.mxu1 %v1110_v20 }
 0x1e8   :  { %v898_v26 = vmax.f32 %v892_v24, 0.0  ;;  %v894_v28 = vpop.f32.mrb[14].mxu0 }
 0x1e9   :  { %v895_v29 = vpop.f32.mrb[15].mxu0  ;;  %v899_v32 = vpack.c.bf16 %v897_v23, %v897_v23 }
 0x1ea   :  { %v900_v30 = vpack.c.bf16 %v898_v26, %v898_v26  ;;  %1117 = vmatpush1.bf16.msra.mxu1 %v1107_v22 }
 0x1eb   :  { %4861 = vmatprep.subr.bf16.mxu1 %v5280_v25 }
 0x1ec   :  { %1062 = vmatprep.mubr.bf16.mxu0 %v900_v30 }
 0x1ed   :  { %4426 = vmatmul.mubr.msk.bf16.vlgmr.msra.gmra.mrb[12].mxu1 %vm77_vm2, %v5769_v27  ;;  %1063 = vmatmul.mubr.bf16.vlgmr.msra.gmra.mrb[16].mxu0 %v899_v32  ;;  %v5307_v32 = vld [vmem:[%s6129_s1 + $0x120] ss:$8 sps:$4 sm:$0xff]  }
 0x1ee   :  { %1369 = vmatpush1.bf16.msra.mxu0 %v5271_v31  ;;  %1400 = vmatprep.mubr.bf16.mxu0 %v5627_v0 }
 0x1ef   :  { %1370 = vmatprep.subr.bf16.mxu0 %v5276_v33  ;;  %4862 = vmatpush3.bf16.msra.mxu1 %v5281_v35  ;;  %v5319_v33 = vld [vmem:[%s6129_s1 + $0x144] ss:$8 sps:$4 sm:$0x1f]   ;;  %v5317_v35 = vld [vmem:[%s6129_s1 + $0x140] ss:$8 sps:$4 sm:$0x1f]  }
 0x1f0   :  { %4863 = vmatprep.subr.bf16.mxu1 %v5282_v36  ;;  %v1622_v36 = vand.u32 %v5319_v33, %v5710_v11  ;;  %v1619_v38 = vand.u32 %v5317_v35, %v5710_v11 }
 0x1f2   :  { %1371 = vmatpush1.bf16.msra.mxu0 %v5274_v37 }
 0x1f3   :  { %1372 = vmatprep.subr.bf16.mxu0 %v1366_v39  ;;  %4864 = vmatpush3.bf16.msra.mxu1 %v5283_v40 }
 0x1f4   :  { %4865 = vmatprep.subr.bf16.mxu1 %v5284_v41  ;;  %v5330_v41 = vld [vmem:[#allocation2 + $0x340] sm:$0xff]  }
 0x1f6   :  { %1373 = vmatpush1.bf16.msra.mxu0 %v1363_v42 }
 0x1f7   :  { %4866 = vmatpush3.bf16.msra.mxu1 %v5285_v43  ;;  %4883 = vmatprep.subr.bf16.mxu0 %v5287_v44 }
 0x1f8   :  { %4867 = vmatprep.subr.bf16.mxu1 %v5286_v45 }
 0x1f9   :  { %4455 = vmatmul.mubr.msk.bf16.vlgmr.msra.gmra.mrb[20].mxu0 %vm77_vm2, %v5769_v27 }
 0x1fa   :  { %4884 = vmatpush3.bf16.msra.mxu0 %v5289_v46  ;;  %v5321_v46 = vld [vmem:[%s6129_s1 + $0x150] ss:$8 sps:$4 sm:$0xff]  }
 0x1fb   :  { %4868 = vmatpush3.bf16.msra.mxu1 %v5288_v47  ;;  %4885 = vmatprep.subr.bf16.mxu0 %v5291_v49  ;;  %v5329_v49 = vld [vmem:[%s6129_s1 + $0x174] ss:$8 sps:$4 sm:$0x1f]  }
 0x1fc   :  { %4869 = vmatprep.subr.bf16.mxu1 %v5290_v48  ;;  %v5326_v48 = vld [vmem:[%s6129_s1 + $0x164] ss:$8 sps:$4 sm:$0xff]  }
 0x1fe   :  { %4886 = vmatpush3.bf16.msra.mxu0 %v5293_v51  ;;  %v5332_v51 = vld [vmem:[#allocation2 + $0x348] sm:$0xff]  }
 0x1ff   :  { %4870 = vmatpush3.bf16.msra.mxu1 %v5292_v50  ;;  %4887 = vmatprep.subr.bf16.mxu0 %v5295_v53  ;;  %v5331_v50 = vld [vmem:[#allocation2 + $0x300] sm:$0xff]   ;;  %v5327_v53 = vld [vmem:[%s6129_s1 + $0x170] ss:$8 sps:$4 sm:$0x1f]  }
 0x200   :  { %4871 = vmatprep.subr.bf16.mxu1 %v5294_v52  ;;  %v5324_v52 = vld [vmem:[%s6129_s1 + $0x160] ss:$8 sps:$4 sm:$0xff]  }
 0x202   :  { %4888 = vmatpush3.bf16.msra.mxu0 %v5297_v55  ;;  %v5333_v55 = vld [vmem:[#allocation2 + $0x308] sm:$0xff]  }
 0x203   :  { %4872 = vmatpush3.bf16.msra.mxu1 %v5296_v54  ;;  %4889 = vmatprep.subr.bf16.mxu0 %v5299_v57  ;;  %v1878_v54 = vand.u32 %v5329_v49, %v5710_v11  ;;  %v1875_v57 = vand.u32 %v5327_v53, %v5710_v11  ;;  %v5362_v49 = vld [vmem:[%s6129_s1 + $0x190] ss:$8 sps:$4 sm:$0xff]  }
 0x204   :  { %4873 = vmatprep.subr.bf16.mxu1 %v5298_v56  ;;  %v5334_v56 = vld [vmem:[#allocation2 + $0x350] sm:$0xff]  }
 0x206   :  { %4890 = vmatpush3.bf16.msra.mxu0 %v5301_v59  ;;  %v5337_v59 = vld [vmem:[#allocation2 + $0x3c0] sm:$0xff]  }
 0x207   :  { %4874 = vmatpush3.bf16.msra.mxu1 %v5300_v58  ;;  %4891 = vmatprep.subr.bf16.mxu0 %v5303_v61  ;;  %v5335_v58 = vld [vmem:[#allocation2 + $0x310] sm:$0xff]   ;;  %v5339_v61 = vld [vmem:[#allocation2 + $0x380] sm:$0xff]  }
 0x208   :  { %4875 = vmatprep.subr.bf16.mxu1 %v5302_v60  ;;  %v5336_v60 = vld [vmem:[#allocation2 + $0x358] sm:$0xff]  }
 0x20a   :  { %4892 = vmatpush3.bf16.msra.mxu0 %v5305_v63  ;;  %v5340_v63 = vld [vmem:[#allocation2 + $0x360] sm:$0xff]  }
 0x20b   :  { %4876 = vmatpush3.bf16.msra.mxu1 %v5304_v62  ;;  %4893 = vmatprep.subr.bf16.mxu0 %v5306_v1  ;;  %v5338_v62 = vld [vmem:[#allocation2 + $0x318] sm:$0xff]   ;;  %v5341_v1 = vld [vmem:[#allocation2 + $0x3c8] sm:$0xff]  }
 0x20c   :  { %1624 = vmatprep.subr.bf16.mxu1 %v5309_v2  ;;  %v5342_v2 = vld [vmem:[#allocation2 + $0x320] sm:$0xff]  }
 0x20e   :  { %4894 = vmatpush3.bf16.msra.mxu0 %v5310_v3  ;;  %v5343_v3 = vld [vmem:[#allocation2 + $0x388] sm:$0xff]  }
 0x20f   :  { %4895 = vmatprep.subr.bf16.mxu0 %v5311_v4  ;;  %v5344_v4 = vld [vmem:[#allocation2 + $0x368] sm:$0xff]  }
 0x212   :  { %4896 = vmatpush3.bf16.msra.mxu0 %v5315_v6  ;;  %v5345_v6 = vld [vmem:[#allocation2 + $0x3d0] sm:$0xff]  }
 0x213   :  { %4897 = vmatprep.subr.bf16.mxu0 %v5316_v7  ;;  %v5346_v7 = vld [vmem:[#allocation2 + $0x328] sm:$0xff]  }
 0x216   :  { %4898 = vmatpush3.bf16.msra.mxu0 %v5320_v8  ;;  %v5347_v8 = vld [vmem:[#allocation2 + $0x390] sm:$0xff]  }
 0x217   :  { %1880 = vmatprep.subr.bf16.mxu0 %v5323_v9  ;;  %v5348_v9 = vld [vmem:[#allocation2 + $0x370] sm:$0xff]  }
 0x2b4   :  { %v4833_v10 = vpop.f32.mrb[8].mxu1 }
 0x2b5   :  { %v4834_v12 = vpop.f32.mrb[9].mxu1 }
 0x2b6   :  { %v4835_v13 = vadd.f32 %v4834_v12, %v4833_v10  ;;  %v4836_v14 = vpop.f32.mrb[10].mxu1  ;;  %v5349_v10 = vld [vmem:[#allocation2 + $0x3d8] sm:$0xff]   ;;  %v5350_v12 = vld [vmem:[#allocation2 + $0x330] sm:$0xff]  }
 0x2b7   :  { %v4837_v15 = vpop.f32.mrb[11].mxu1  ;;  %v5352_v14 = vld [vmem:[#allocation2 + $0x378] sm:$0xff]  }
 0x2b8   :  { %v814_v16 = vadd.f32 %v4835_v13, %v5790_v5  ;;  %v5314_v5 = vld [vmem:[%s6129_s1 + $0x134] ss:$8 sps:$4 sm:$0xff]   ;;  %v5353_v15 = vld [vmem:[#allocation2 + $0x3e0] sm:$0xff]  }
 0x2b9   :  { %v5351_v13 = vld [vmem:[#allocation2 + $0x398] sm:$0xff]  }
 0x2c0   :  { %v1146_v17 = vpop.f32.mrb[12].mxu1  ;;  %v4855_v18 = vpop.f32.mrb[16].mxu0 }
 0x2c1   :  { %v1153_v19 = vmax.f32 %v1146_v17, 0.0  ;;  %v1148_v20 = vpop.f32.mrb[13].mxu1  ;;  %v4856_v21 = vpop.f32.mrb[17].mxu0  ;;  %v5355_v17 = vld [vmem:[#allocation2 + $0x3a0] sm:$0xff]  }
 0x2c2   :  { %v1154_v22 = vmax.f32 %v1148_v20, 0.0  ;;  %v4857_v23 = vadd.f32 %v4856_v21, %v4855_v18  ;;  %v4858_v24 = vpop.f32.mrb[18].mxu0  ;;  %v1150_v25 = vpop.f32.mrb[14].mxu1  ;;  %v5356_v18 = vld [vmem:[#allocation2 + $0x3e8] sm:$0xff]   ;;  %v5361_v21 = vld [vmem:[#allocation2 + $0x3f0] sm:$0xff]  }
 0x2c3   :  { %v1155_v26 = vpack.c.bf16 %v1153_v19, %v1153_v19  ;;  %v4859_v28 = vpop.f32.mrb[19].mxu0  ;;  %v1151_v29 = vpop.f32.mrb[15].mxu1  ;;  %v5359_v19 = vld [vmem:[%s6129_s1 + $0x184] ss:$8 sps:$4 sm:$0xff]   ;;  %v5370_v24 = vld [vmem:[#allocation2 + $0x3b8] sm:$0xff]  }
 0x2c4   :  { %v1156_v30 = vpack.c.bf16 %v1154_v22, %v1154_v22  ;;  %v5839_v31 = vadd.f32 %v4857_v23, %v814_v16  ;;  %v5354_v16 = vld [vmem:[#allocation2 + $0x338] sm:$0xff]   ;;  %v5360_v20 = vld [vmem:[#allocation2 + $0x3a8] sm:$0xff]   ;;  %v5365_v22 = vld [vmem:[#allocation2 + $0x3b0] sm:$0xff]  }
 0x2c5   :  { %v5366_v23 = vld [vmem:[#allocation2 + $0x3f8] sm:$0xff]  }
 0x2c6   :  { %1318 = vmatprep.mubr.bf16.mxu1 %v1156_v30  ;;  %v5373_v25 = vld [vmem:[%s6129_s1 + $0x1b4] ss:$8 sps:$4 sm:$0xff]  }
 0x2c7   :  { %1319 = vmatmul.mubr.bf16.vlgmr.msra.gmra.mrb[16].mxu1 %v1155_v26 }
 0x2c8   :  { %1625 = vmatpush1.bf16.msra.mxu1 %v5307_v32  ;;  %1656 = vmatprep.mubr.bf16.mxu1 %v5627_v0 }
 0x2c9   :  { %1626 = vmatprep.subr.bf16.mxu1 %v5314_v5 }
 0x2cc   :  { %1627 = vmatpush1.bf16.msra.mxu1 %v5312_v34  ;;  %v1402_v37 = vpop.f32.mrb[20].mxu0 }
 0x2cd   :  { %v1409_v39 = vmax.f32 %v1402_v37, 0.0  ;;  %v1404_v40 = vpop.f32.mrb[21].mxu0  ;;  %1628 = vmatprep.subr.bf16.mxu1 %v1622_v36 }
 0x2ce   :  { %v1410_v42 = vmax.f32 %v1404_v40, 0.0  ;;  %v1406_v43 = vpop.f32.mrb[22].mxu0 }
 0x2cf   :  { %v1407_v44 = vpop.f32.mrb[23].mxu0  ;;  %v1411_v47 = vpack.c.bf16 %v1409_v39, %v1409_v39 }
 0x2d0   :  { %v1412_v45 = vpack.c.bf16 %v1410_v42, %v1410_v42  ;;  %1629 = vmatpush1.bf16.msra.mxu1 %v1619_v38 }
 0x2d1   :  { %4905 = vmatprep.subr.bf16.mxu1 %v5330_v41 }
 0x2d2   :  { %1574 = vmatprep.mubr.bf16.mxu0 %v1412_v45 }
 0x2d3   :  { %4484 = vmatmul.mubr.msk.bf16.vlgmr.msra.gmra.mrb[20].mxu1 %vm77_vm2, %v5769_v27  ;;  %1575 = vmatmul.mubr.bf16.vlgmr.msra.gmra.mrb[24].mxu0 %v1411_v47  ;;  %v5357_v47 = vld [vmem:[%s6129_s1 + $0x180] ss:$8 sps:$4 sm:$0xff]  }
 0x2d4   :  { %1881 = vmatpush1.bf16.msra.mxu0 %v5321_v46  ;;  %1912 = vmatprep.mubr.bf16.mxu0 %v5627_v0 }
 0x2d5   :  { %1882 = vmatprep.subr.bf16.mxu0 %v5326_v48  ;;  %4906 = vmatpush3.bf16.msra.mxu1 %v5331_v50  ;;  %v5369_v48 = vld [vmem:[%s6129_s1 + $0x1a4] ss:$8 sps:$4 sm:$0x1f]   ;;  %v5367_v50 = vld [vmem:[%s6129_s1 + $0x1a0] ss:$8 sps:$4 sm:$0x1f]  }
 0x2d6   :  { %4907 = vmatprep.subr.bf16.mxu1 %v5332_v51  ;;  %v2134_v51 = vand.u32 %v5369_v48, %v5710_v11  ;;  %v2131_v53 = vand.u32 %v5367_v50, %v5710_v11 }
 0x2d8   :  { %1883 = vmatpush1.bf16.msra.mxu0 %v5324_v52 }
 0x2d9   :  { %1884 = vmatprep.subr.bf16.mxu0 %v1878_v54  ;;  %4908 = vmatpush3.bf16.msra.mxu1 %v5333_v55 }
 0x2da   :  { %4909 = vmatprep.subr.bf16.mxu1 %v5334_v56  ;;  %v5380_v56 = vld [vmem:[#allocation2 + $0x440] sm:$0xff]  }
 0x2dc   :  { %1885 = vmatpush1.bf16.msra.mxu0 %v1875_v57 }
 0x2dd   :  { %4910 = vmatpush3.bf16.msra.mxu1 %v5335_v58  ;;  %4927 = vmatprep.subr.bf16.mxu0 %v5337_v59 }
 0x2de   :  { %4911 = vmatprep.subr.bf16.mxu1 %v5336_v60 }
 0x2df   :  { %4513 = vmatmul.mubr.msk.bf16.vlgmr.msra.gmra.mrb[28].mxu0 %vm77_vm2, %v5769_v27 }
 0x2e0   :  { %4928 = vmatpush3.bf16.msra.mxu0 %v5339_v61  ;;  %v5371_v61 = vld [vmem:[%s6129_s1 + $0x1b0] ss:$8 sps:$4 sm:$0xff]  }
 0x2e1   :  { %4912 = vmatpush3.bf16.msra.mxu1 %v5338_v62  ;;  %4929 = vmatprep.subr.bf16.mxu0 %v5341_v1  ;;  %v5379_v1 = vld [vmem:[%s6129_s1 + $0x1d4] ss:$8 sps:$4 sm:$0x1f]  }
 0x2e2   :  { %4913 = vmatprep.subr.bf16.mxu1 %v5340_v63  ;;  %v5376_v63 = vld [vmem:[%s6129_s1 + $0x1c4] ss:$8 sps:$4 sm:$0xff]  }
 0x2e4   :  { %4930 = vmatpush3.bf16.msra.mxu0 %v5343_v3  ;;  %v5382_v3 = vld [vmem:[#allocation2 + $0x448] sm:$0xff]  }
 0x2e5   :  { %4914 = vmatpush3.bf16.msra.mxu1 %v5342_v2  ;;  %4931 = vmatprep.subr.bf16.mxu0 %v5345_v6  ;;  %v5381_v2 = vld [vmem:[#allocation2 + $0x400] sm:$0xff]   ;;  %v5377_v6 = vld [vmem:[%s6129_s1 + $0x1d0] ss:$8 sps:$4 sm:$0x1f]  }
 0x2e6   :  { %4915 = vmatprep.subr.bf16.mxu1 %v5344_v4  ;;  %v5374_v4 = vld [vmem:[%s6129_s1 + $0x1c0] ss:$8 sps:$4 sm:$0xff]  }
 0x2e8   :  { %4932 = vmatpush3.bf16.msra.mxu0 %v5347_v8  ;;  %v5383_v8 = vld [vmem:[#allocation2 + $0x408] sm:$0xff]  }
 0x2e9   :  { %4916 = vmatpush3.bf16.msra.mxu1 %v5346_v7  ;;  %4933 = vmatprep.subr.bf16.mxu0 %v5349_v10  ;;  %v2390_v7 = vand.u32 %v5379_v1, %v5710_v11  ;;  %v2387_v10 = vand.u32 %v5377_v6, %v5710_v11  ;;  %v5412_v1 = vld [vmem:[%s6129_s1 + $0x1f0] ss:$8 sps:$4 sm:$0xff]  }
 0x2ea   :  { %4917 = vmatprep.subr.bf16.mxu1 %v5348_v9  ;;  %v5384_v9 = vld [vmem:[#allocation2 + $0x450] sm:$0xff]  }
 0x2ec   :  { %4934 = vmatpush3.bf16.msra.mxu0 %v5351_v13  ;;  %v5387_v13 = vld [vmem:[#allocation2 + $0x4c0] sm:$0xff]  }
 0x2ed   :  { %4918 = vmatpush3.bf16.msra.mxu1 %v5350_v12  ;;  %4935 = vmatprep.subr.bf16.mxu0 %v5353_v15  ;;  %v5385_v12 = vld [vmem:[#allocation2 + $0x410] sm:$0xff]   ;;  %v5389_v15 = vld [vmem:[#allocation2 + $0x480] sm:$0xff]  }
 0x2ee   :  { %4919 = vmatprep.subr.bf16.mxu1 %v5352_v14  ;;  %v5386_v14 = vld [vmem:[#allocation2 + $0x458] sm:$0xff]  }
 0x2f0   :  { %4936 = vmatpush3.bf16.msra.mxu0 %v5355_v17  ;;  %v5390_v17 = vld [vmem:[#allocation2 + $0x460] sm:$0xff]  }
 0x2f1   :  { %4920 = vmatpush3.bf16.msra.mxu1 %v5354_v16  ;;  %4937 = vmatprep.subr.bf16.mxu0 %v5356_v18  ;;  %v5388_v16 = vld [vmem:[#allocation2 + $0x418] sm:$0xff]   ;;  %v5391_v18 = vld [vmem:[#allocation2 + $0x4c8] sm:$0xff]  }
 0x2f2   :  { %2136 = vmatprep.subr.bf16.mxu1 %v5359_v19  ;;  %v5392_v19 = vld [vmem:[#allocation2 + $0x420] sm:$0xff]  }
 0x2f4   :  { %4938 = vmatpush3.bf16.msra.mxu0 %v5360_v20  ;;  %v5393_v20 = vld [vmem:[#allocation2 + $0x488] sm:$0xff]  }
 0x2f5   :  { %4939 = vmatprep.subr.bf16.mxu0 %v5361_v21  ;;  %v5394_v21 = vld [vmem:[#allocation2 + $0x468] sm:$0xff]  }
 0x2f8   :  { %4940 = vmatpush3.bf16.msra.mxu0 %v5365_v22  ;;  %v5395_v22 = vld [vmem:[#allocation2 + $0x4d0] sm:$0xff]  }
 0x2f9   :  { %4941 = vmatprep.subr.bf16.mxu0 %v5366_v23  ;;  %v5396_v23 = vld [vmem:[#allocation2 + $0x428] sm:$0xff]  }
 0x2fc   :  { %4942 = vmatpush3.bf16.msra.mxu0 %v5370_v24  ;;  %v5397_v24 = vld [vmem:[#allocation2 + $0x490] sm:$0xff]  }
 0x2fd   :  { %2392 = vmatprep.subr.bf16.mxu0 %v5373_v25  ;;  %v5398_v25 = vld [vmem:[#allocation2 + $0x470] sm:$0xff]  }
 0x39a   :  { %v4877_v26 = vpop.f32.mrb[16].mxu1 }
 0x39b   :  { %v4878_v28 = vpop.f32.mrb[17].mxu1 }
 0x39c   :  { %v4879_v29 = vadd.f32 %v4878_v28, %v4877_v26  ;;  %v4880_v30 = vpop.f32.mrb[18].mxu1  ;;  %v5399_v26 = vld [vmem:[#allocation2 + $0x4d8] sm:$0xff]   ;;  %v5400_v28 = vld [vmem:[#allocation2 + $0x430] sm:$0xff]  }
 0x39d   :  { %v4881_v32 = vpop.f32.mrb[19].mxu1  ;;  %v5402_v30 = vld [vmem:[#allocation2 + $0x478] sm:$0xff]  }
 0x39e   :  { %v1326_v5 = vadd.f32 %v4879_v29, %v5839_v31  ;;  %v5364_v31 = vld [vmem:[%s6129_s1 + $0x194] ss:$8 sps:$4 sm:$0xff]   ;;  %v5403_v32 = vld [vmem:[#allocation2 + $0x4e0] sm:$0xff]  }
 0x39f   :  { %v5401_v29 = vld [vmem:[#allocation2 + $0x498] sm:$0xff]  }
 0x3a6   :  { %v1658_v33 = vpop.f32.mrb[20].mxu1  ;;  %v4899_v34 = vpop.f32.mrb[24].mxu0 }
 0x3a7   :  { %v1665_v35 = vmax.f32 %v1658_v33, 0.0  ;;  %v1660_v36 = vpop.f32.mrb[21].mxu1  ;;  %v4900_v37 = vpop.f32.mrb[25].mxu0  ;;  %v5405_v33 = vld [vmem:[#allocation2 + $0x4a0] sm:$0xff]  }
 0x3a8   :  { %v1666_v38 = vmax.f32 %v1660_v36, 0.0  ;;  %v4901_v39 = vadd.f32 %v4900_v37, %v4899_v34  ;;  %v4902_v40 = vpop.f32.mrb[26].mxu0  ;;  %v1662_v41 = vpop.f32.mrb[22].mxu1  ;;  %v5406_v34 = vld [vmem:[#allocation2 + $0x4e8] sm:$0xff]   ;;  %v5411_v37 = vld [vmem:[#allocation2 + $0x4f0] sm:$0xff]  }
 0x3a9   :  { %v1667_v42 = vpack.c.bf16 %v1665_v35, %v1665_v35  ;;  %v4903_v43 = vpop.f32.mrb[27].mxu0  ;;  %v1663_v44 = vpop.f32.mrb[23].mxu1  ;;  %v5409_v35 = vld [vmem:[%s6129_s1 + $0x1e4] ss:$8 sps:$4 sm:$0xff]   ;;  %v5420_v40 = vld [vmem:[#allocation2 + $0x4b8] sm:$0xff]  }
 0x3aa   :  { %v1668_v45 = vpack.c.bf16 %v1666_v38, %v1666_v38  ;;  %v5888_v46 = vadd.f32 %v4901_v39, %v1326_v5  ;;  %v5404_v5 = vld [vmem:[#allocation2 + $0x438] sm:$0xff]   ;;  %v5410_v36 = vld [vmem:[#allocation2 + $0x4a8] sm:$0xff]   ;;  %v5415_v38 = vld [vmem:[#allocation2 + $0x4b0] sm:$0xff]  }
 0x3ab   :  { %v5416_v39 = vld [vmem:[#allocation2 + $0x4f8] sm:$0xff]  }
 0x3ac   :  { %1830 = vmatprep.mubr.bf16.mxu1 %v1668_v45  ;;  %v5423_v41 = vld [vmem:[%s6129_s1 + $0x214] ss:$8 sps:$4 sm:$0xff]  }
 0x3ad   :  { %1831 = vmatmul.mubr.bf16.vlgmr.msra.gmra.mrb[24].mxu1 %v1667_v42 }
 0x3ae   :  { %2137 = vmatpush1.bf16.msra.mxu1 %v5357_v47  ;;  %2168 = vmatprep.mubr.bf16.mxu1 %v5627_v0 }
 0x3af   :  { %2138 = vmatprep.subr.bf16.mxu1 %v5364_v31 }
 0x3b2   :  { %2139 = vmatpush1.bf16.msra.mxu1 %v5362_v49  ;;  %v1914_v52 = vpop.f32.mrb[28].mxu0 }
 0x3b3   :  { %v1921_v54 = vmax.f32 %v1914_v52, 0.0  ;;  %v1916_v55 = vpop.f32.mrb[29].mxu0  ;;  %2140 = vmatprep.subr.bf16.mxu1 %v2134_v51 }
 0x3b4   :  { %v1922_v57 = vmax.f32 %v1916_v55, 0.0  ;;  %v1918_v58 = vpop.f32.mrb[30].mxu0 }
 0x3b5   :  { %v1919_v59 = vpop.f32.mrb[31].mxu0  ;;  %v1923_v62 = vpack.c.bf16 %v1921_v54, %v1921_v54 }
 0x3b6   :  { %v1924_v60 = vpack.c.bf16 %v1922_v57, %v1922_v57  ;;  %2141 = vmatpush1.bf16.msra.mxu1 %v2131_v53 }
 0x3b7   :  { %4949 = vmatprep.subr.bf16.mxu1 %v5380_v56 }
 0x3b8   :  { %2086 = vmatprep.mubr.bf16.mxu0 %v1924_v60 }
 0x3b9   :  { %4542 = vmatmul.mubr.msk.bf16.vlgmr.msra.gmra.mrb[28].mxu1 %vm77_vm2, %v5769_v27  ;;  %2087 = vmatmul.mubr.bf16.vlgmr.msra.gmra.mrb[32].mxu0 %v1923_v62  ;;  %v5407_v62 = vld [vmem:[%s6129_s1 + $0x1e0] ss:$8 sps:$4 sm:$0xff]  }
 0x3ba   :  { %2393 = vmatpush1.bf16.msra.mxu0 %v5371_v61  ;;  %2424 = vmatprep.mubr.bf16.mxu0 %v5627_v0 }
 0x3bb   :  { %2394 = vmatprep.subr.bf16.mxu0 %v5376_v63  ;;  %4950 = vmatpush3.bf16.msra.mxu1 %v5381_v2  ;;  %v5419_v63 = vld [vmem:[%s6129_s1 + $0x204] ss:$8 sps:$4 sm:$0x1f]   ;;  %v5417_v2 = vld [vmem:[%s6129_s1 + $0x200] ss:$8 sps:$4 sm:$0x1f]  }
 0x3bc   :  { %4951 = vmatprep.subr.bf16.mxu1 %v5382_v3  ;;  %v2646_v3 = vand.u32 %v5419_v63, %v5710_v11  ;;  %v2643_v6 = vand.u32 %v5417_v2, %v5710_v11 }
 0x3be   :  { %2395 = vmatpush1.bf16.msra.mxu0 %v5374_v4 }
 0x3bf   :  { %2396 = vmatprep.subr.bf16.mxu0 %v2390_v7  ;;  %4952 = vmatpush3.bf16.msra.mxu1 %v5383_v8 }
 0x3c0   :  { %4953 = vmatprep.subr.bf16.mxu1 %v5384_v9  ;;  %v5430_v9 = vld [vmem:[#allocation2 + $0x540] sm:$0xff]  }
 0x3c2   :  { %2397 = vmatpush1.bf16.msra.mxu0 %v2387_v10 }
 0x3c3   :  { %4954 = vmatpush3.bf16.msra.mxu1 %v5385_v12  ;;  %4971 = vmatprep.subr.bf16.mxu0 %v5387_v13 }
 0x3c4   :  { %4955 = vmatprep.subr.bf16.mxu1 %v5386_v14 }
 0x3c5   :  { %4571 = vmatmul.mubr.msk.bf16.vlgmr.msra.gmra.mrb[36].mxu0 %vm77_vm2, %v5769_v27 }
 0x3c6   :  { %4972 = vmatpush3.bf16.msra.mxu0 %v5389_v15  ;;  %v5421_v15 = vld [vmem:[%s6129_s1 + $0x210] ss:$8 sps:$4 sm:$0xff]  }
 0x3c7   :  { %4956 = vmatpush3.bf16.msra.mxu1 %v5388_v16  ;;  %4973 = vmatprep.subr.bf16.mxu0 %v5391_v18  ;;  %v5429_v18 = vld [vmem:[%s6129_s1 + $0x234] ss:$8 sps:$4 sm:$0x1f]  }
 0x3c8   :  { %4957 = vmatprep.subr.bf16.mxu1 %v5390_v17  ;;  %v5426_v17 = vld [vmem:[%s6129_s1 + $0x224] ss:$8 sps:$4 sm:$0xff]  }
 0x3ca   :  { %4974 = vmatpush3.bf16.msra.mxu0 %v5393_v20  ;;  %v5432_v20 = vld [vmem:[#allocation2 + $0x548] sm:$0xff]  }
 0x3cb   :  { %4958 = vmatpush3.bf16.msra.mxu1 %v5392_v19  ;;  %4975 = vmatprep.subr.bf16.mxu0 %v5395_v22  ;;  %v5431_v19 = vld [vmem:[#allocation2 + $0x500] sm:$0xff]   ;;  %v5427_v22 = vld [vmem:[%s6129_s1 + $0x230] ss:$8 sps:$4 sm:$0x1f]  }
 0x3cc   :  { %4959 = vmatprep.subr.bf16.mxu1 %v5394_v21  ;;  %v5424_v21 = vld [vmem:[%s6129_s1 + $0x220] ss:$8 sps:$4 sm:$0xff]  }
 0x3ce   :  { %4976 = vmatpush3.bf16.msra.mxu0 %v5397_v24  ;;  %v5433_v24 = vld [vmem:[#allocation2 + $0x508] sm:$0xff]  }
 0x3cf   :  { %4960 = vmatpush3.bf16.msra.mxu1 %v5396_v23  ;;  %4977 = vmatprep.subr.bf16.mxu0 %v5399_v26  ;;  %v2902_v23 = vand.u32 %v5429_v18, %v5710_v11  ;;  %v5435_v26 = vld [vmem:[#allocation2 + $0x510] sm:$0xff]  }
 0x3d0   :  { %4961 = vmatprep.subr.bf16.mxu1 %v5398_v25  ;;  %v5434_v25 = vld [vmem:[#allocation2 + $0x550] sm:$0xff]  }
 0x3d1   :  { %v5462_v18 = vld [vmem:[%s6129_s1 + $0x250] ss:$8 sps:$4 sm:$0xff]  }
 0x3d2   :  { %4978 = vmatpush3.bf16.msra.mxu0 %v5401_v29  ;;  %v5436_v29 = vld [vmem:[#allocation2 + $0x558] sm:$0xff]  }
 0x3d3   :  { %4962 = vmatpush3.bf16.msra.mxu1 %v5400_v28  ;;  %4979 = vmatprep.subr.bf16.mxu0 %v5403_v32  ;;  %v5437_v28 = vld [vmem:[#allocation2 + $0x5c0] sm:$0xff]   ;;  %v5438_v32 = vld [vmem:[#allocation2 + $0x518] sm:$0xff]  }
 0x3d4   :  { %4963 = vmatprep.subr.bf16.mxu1 %v5402_v30  ;;  %v5439_v30 = vld [vmem:[#allocation2 + $0x580] sm:$0xff]  }
 0x3d6   :  { %4980 = vmatpush3.bf16.msra.mxu0 %v5405_v33  ;;  %v5440_v33 = vld [vmem:[#allocation2 + $0x560] sm:$0xff]  }
 0x3d7   :  { %4964 = vmatpush3.bf16.msra.mxu1 %v5404_v5  ;;  %4981 = vmatprep.subr.bf16.mxu0 %v5406_v34  ;;  %v5980_v5 = vld [vmem:[%s6128_s0] sm:$0xf]  ;;  %v5441_v34 = vld [vmem:[#allocation2 + $0x5c8] sm:$0xff]  }
 0x3d8   :  { %2648 = vmatprep.subr.bf16.mxu1 %v5409_v35  ;;  %v5442_v35 = vld [vmem:[#allocation2 + $0x520] sm:$0xff]  }
 0x3da   :  { %4982 = vmatpush3.bf16.msra.mxu0 %v5410_v36  ;;  %v5443_v36 = vld [vmem:[#allocation2 + $0x588] sm:$0xff]  }
 0x3db   :  { %4983 = vmatprep.subr.bf16.mxu0 %v5411_v37  ;;  %v5444_v37 = vld [vmem:[#allocation2 + $0x568] sm:$0xff]  }
 0x3de   :  { %4984 = vmatpush3.bf16.msra.mxu0 %v5415_v38  ;;  %v5445_v38 = vld [vmem:[#allocation2 + $0x5d0] sm:$0xff]  }
 0x3df   :  { %4985 = vmatprep.subr.bf16.mxu0 %v5416_v39  ;;  %v5446_v39 = vld [vmem:[#allocation2 + $0x528] sm:$0xff]  }
 0x3e2   :  { %4986 = vmatpush3.bf16.msra.mxu0 %v5420_v40  ;;  %v5447_v40 = vld [vmem:[#allocation2 + $0x590] sm:$0xff]  }
 0x3e3   :  { %2904 = vmatprep.subr.bf16.mxu0 %v5423_v41  ;;  %v5448_v41 = vld [vmem:[#allocation2 + $0x570] sm:$0xff]  }
 0x480   :  { %v4921_v42 = vpop.f32.mrb[24].mxu1 }
 0x481   :  { %v4922_v43 = vpop.f32.mrb[25].mxu1 }
 0x482   :  { %v4923_v44 = vadd.f32 %v4922_v43, %v4921_v42  ;;  %v4924_v45 = vpop.f32.mrb[26].mxu1  ;;  %v5449_v42 = vld [vmem:[#allocation2 + $0x5d8] sm:$0xff]   ;;  %v5450_v43 = vld [vmem:[#allocation2 + $0x530] sm:$0xff]  }
 0x483   :  { %v4925_v47 = vpop.f32.mrb[27].mxu1  ;;  %v5452_v45 = vld [vmem:[#allocation2 + $0x578] sm:$0xff]  }
 0x484   :  { %v1838_v31 = vadd.f32 %v4923_v44, %v5888_v46  ;;  %v5414_v46 = vld [vmem:[%s6129_s1 + $0x1f4] ss:$8 sps:$4 sm:$0xff]   ;;  %v5453_v47 = vld [vmem:[#allocation2 + $0x5e0] sm:$0xff]  }
 0x485   :  { %v5451_v44 = vld [vmem:[#allocation2 + $0x598] sm:$0xff]  }
 0x48c   :  { %v2170_v48 = vpop.f32.mrb[28].mxu1  ;;  %v4943_v49 = vpop.f32.mrb[32].mxu0 }
 0x48d   :  { %v2177_v50 = vmax.f32 %v2170_v48, 0.0  ;;  %v2172_v51 = vpop.f32.mrb[29].mxu1  ;;  %v4944_v52 = vpop.f32.mrb[33].mxu0  ;;  %v5455_v48 = vld [vmem:[#allocation2 + $0x5a0] sm:$0xff]  }
 0x48e   :  { %v2178_v53 = vmax.f32 %v2172_v51, 0.0  ;;  %v4945_v54 = vadd.f32 %v4944_v52, %v4943_v49  ;;  %v4946_v55 = vpop.f32.mrb[34].mxu0  ;;  %v2174_v56 = vpop.f32.mrb[30].mxu1  ;;  %v5456_v49 = vld [vmem:[#allocation2 + $0x5e8] sm:$0xff]   ;;  %v5461_v52 = vld [vmem:[#allocation2 + $0x5f0] sm:$0xff]  }
 0x48f   :  { %v2179_v57 = vpack.c.bf16 %v2177_v50, %v2177_v50  ;;  %v4947_v58 = vpop.f32.mrb[35].mxu0  ;;  %v2175_v59 = vpop.f32.mrb[31].mxu1  ;;  %v5459_v50 = vld [vmem:[%s6129_s1 + $0x244] ss:$8 sps:$4 sm:$0xff]   ;;  %v5470_v55 = vld [vmem:[#allocation2 + $0x5b8] sm:$0xff]  }
 0x490   :  { %v2180_v60 = vpack.c.bf16 %v2178_v53, %v2178_v53  ;;  %v5937_v61 = vadd.f32 %v4945_v54, %v1838_v31  ;;  %v5454_v31 = vld [vmem:[#allocation2 + $0x538] sm:$0xff]   ;;  %v5460_v51 = vld [vmem:[#allocation2 + $0x5a8] sm:$0xff]   ;;  %v5465_v53 = vld [vmem:[#allocation2 + $0x5b0] sm:$0xff]  }
 0x491   :  { %v5466_v54 = vld [vmem:[#allocation2 + $0x5f8] sm:$0xff]  }
 0x492   :  { %2342 = vmatprep.mubr.bf16.mxu1 %v2180_v60  ;;  %v5473_v56 = vld [vmem:[%s6129_s1 + $0x274] ss:$8 sps:$4 sm:$0xff]  }
 0x493   :  { %2343 = vmatmul.mubr.bf16.vlgmr.msra.gmra.mrb[32].mxu1 %v2179_v57 }
 0x494   :  { %2649 = vmatpush1.bf16.msra.mxu1 %v5407_v62  ;;  %2680 = vmatprep.mubr.bf16.mxu1 %v5627_v0 }
 0x495   :  { %2650 = vmatprep.subr.bf16.mxu1 %v5414_v46 }
 0x498   :  { %2651 = vmatpush1.bf16.msra.mxu1 %v5412_v1  ;;  %v2426_v4 = vpop.f32.mrb[36].mxu0 }
 0x499   :  { %v2433_v7 = vmax.f32 %v2426_v4, 0.0  ;;  %v2428_v8 = vpop.f32.mrb[37].mxu0  ;;  %2652 = vmatprep.subr.bf16.mxu1 %v2646_v3 }
 0x49a   :  { %v2434_v10 = vmax.f32 %v2428_v8, 0.0  ;;  %v2430_v12 = vpop.f32.mrb[38].mxu0 }
 0x49b   :  { %v2431_v13 = vpop.f32.mrb[39].mxu0  ;;  %v2435_v16 = vpack.c.bf16 %v2433_v7, %v2433_v7 }
 0x49c   :  { %v2436_v14 = vpack.c.bf16 %v2434_v10, %v2434_v10  ;;  %2653 = vmatpush1.bf16.msra.mxu1 %v2643_v6 }
 0x49d   :  { %4993 = vmatprep.subr.bf16.mxu1 %v5430_v9 }
 0x49e   :  { %2598 = vmatprep.mubr.bf16.mxu0 %v2436_v14 }
 0x49f   :  { %4600 = vmatmul.mubr.msk.bf16.vlgmr.msra.gmra.mrb[36].mxu1 %vm77_vm2, %v5769_v27  ;;  %2599 = vmatmul.mubr.bf16.vlgmr.msra.gmra.mrb[40].mxu0 %v2435_v16  ;;  %v2899_v27 = vand.u32 %v5427_v22, %v5710_v11  ;;  %v5457_v16 = vld [vmem:[%s6129_s1 + $0x240] ss:$8 sps:$4 sm:$0xff]  }
 0x4a0   :  { %2905 = vmatpush1.bf16.msra.mxu0 %v5421_v15  ;;  %2936 = vmatprep.mubr.bf16.mxu0 %v5627_v0 }
 0x4a1   :  { %2906 = vmatprep.subr.bf16.mxu0 %v5426_v17  ;;  %4994 = vmatpush3.bf16.msra.mxu1 %v5431_v19  ;;  %v5469_v17 = vld [vmem:[%s6129_s1 + $0x264] ss:$8 sps:$4 sm:$0x1f]   ;;  %v5467_v19 = vld [vmem:[%s6129_s1 + $0x260] ss:$8 sps:$4 sm:$0x1f]  }
 0x4a2   :  { %4995 = vmatprep.subr.bf16.mxu1 %v5432_v20  ;;  %v3158_v20 = vand.u32 %v5469_v17, %v5710_v11  ;;  %v3155_v22 = vand.u32 %v5467_v19, %v5710_v11 }
 0x4a4   :  { %2907 = vmatpush1.bf16.msra.mxu0 %v5424_v21 }
 0x4a5   :  { %2908 = vmatprep.subr.bf16.mxu0 %v2902_v23  ;;  %4996 = vmatpush3.bf16.msra.mxu1 %v5433_v24 }
 0x4a6   :  { %4997 = vmatprep.subr.bf16.mxu1 %v5434_v25  ;;  %v5480_v25 = vld [vmem:[#allocation2 + $0x640] sm:$0xff]  }
 0x4a8   :  { %2909 = vmatpush1.bf16.msra.mxu0 %v2899_v27 }
 0x4a9   :  { %4998 = vmatpush3.bf16.msra.mxu1 %v5435_v26  ;;  %5015 = vmatprep.subr.bf16.mxu0 %v5437_v28 }
 0x4aa   :  { %4999 = vmatprep.subr.bf16.mxu1 %v5436_v29 }
 0x4ab   :  { %4629 = vmatmul.mubr.msk.bf16.vlgmr.msra.gmra.mrb[44].mxu0 %vm77_vm2, %v5980_v5 }
 0x4ac   :  { %5016 = vmatpush3.bf16.msra.mxu0 %v5439_v30  ;;  %v5471_v30 = vld [vmem:[%s6129_s1 + $0x270] ss:$8 sps:$4 sm:$0xff]  }
 0x4ad   :  { %5000 = vmatpush3.bf16.msra.mxu1 %v5438_v32  ;;  %5017 = vmatprep.subr.bf16.mxu0 %v5441_v34  ;;  %v5479_v34 = vld [vmem:[%s6129_s1 + $0x294] ss:$8 sps:$4 sm:$0x1f]  }
 0x4ae   :  { %5001 = vmatprep.subr.bf16.mxu1 %v5440_v33  ;;  %v5476_v33 = vld [vmem:[%s6129_s1 + $0x284] ss:$8 sps:$4 sm:$0xff]  }
 0x4b0   :  { %5018 = vmatpush3.bf16.msra.mxu0 %v5443_v36  ;;  %v5482_v36 = vld [vmem:[#allocation2 + $0x648] sm:$0xff]  }
 0x4b1   :  { %5002 = vmatpush3.bf16.msra.mxu1 %v5442_v35  ;;  %5019 = vmatprep.subr.bf16.mxu0 %v5445_v38  ;;  %v5481_v35 = vld [vmem:[#allocation2 + $0x600] sm:$0xff]   ;;  %v5477_v38 = vld [vmem:[%s6129_s1 + $0x290] ss:$8 sps:$4 sm:$0x1f]  }
 0x4b2   :  { %5003 = vmatprep.subr.bf16.mxu1 %v5444_v37  ;;  %v5474_v37 = vld [vmem:[%s6129_s1 + $0x280] ss:$8 sps:$4 sm:$0xff]  }
 0x4b4   :  { %5020 = vmatpush3.bf16.msra.mxu0 %v5447_v40  ;;  %v5483_v40 = vld [vmem:[#allocation2 + $0x608] sm:$0xff]  }
 0x4b5   :  { %5004 = vmatpush3.bf16.msra.mxu1 %v5446_v39  ;;  %5021 = vmatprep.subr.bf16.mxu0 %v5449_v42  ;;  %v3414_v39 = vand.u32 %v5479_v34, %v5710_v11  ;;  %v3411_v42 = vand.u32 %v5477_v38, %v5710_v11  ;;  %v5512_v34 = vld [vmem:[%s6129_s1 + $0x2b0] ss:$8 sps:$4 sm:$0xff]  }
 0x4b6   :  { %5005 = vmatprep.subr.bf16.mxu1 %v5448_v41  ;;  %v5484_v41 = vld [vmem:[#allocation2 + $0x650] sm:$0xff]  }
 0x4b8   :  { %5022 = vmatpush3.bf16.msra.mxu0 %v5451_v44  ;;  %v5487_v44 = vld [vmem:[#allocation2 + $0x6c0] sm:$0xff]  }
 0x4b9   :  { %5006 = vmatpush3.bf16.msra.mxu1 %v5450_v43  ;;  %5023 = vmatprep.subr.bf16.mxu0 %v5453_v47  ;;  %v5485_v43 = vld [vmem:[#allocation2 + $0x610] sm:$0xff]   ;;  %v5489_v47 = vld [vmem:[#allocation2 + $0x680] sm:$0xff]  }
 0x4ba   :  { %5007 = vmatprep.subr.bf16.mxu1 %v5452_v45  ;;  %v5486_v45 = vld [vmem:[#allocation2 + $0x658] sm:$0xff]  }
 0x4bc   :  { %5024 = vmatpush3.bf16.msra.mxu0 %v5455_v48  ;;  %v5490_v48 = vld [vmem:[#allocation2 + $0x660] sm:$0xff]  }
 0x4bd   :  { %5008 = vmatpush3.bf16.msra.mxu1 %v5454_v31  ;;  %5025 = vmatprep.subr.bf16.mxu0 %v5456_v49  ;;  %v5488_v31 = vld [vmem:[#allocation2 + $0x618] sm:$0xff]   ;;  %v5491_v49 = vld [vmem:[#allocation2 + $0x6c8] sm:$0xff]  }
 0x4be   :  { %3160 = vmatprep.subr.bf16.mxu1 %v5459_v50  ;;  %v5492_v50 = vld [vmem:[#allocation2 + $0x620] sm:$0xff]  }
 0x4c0   :  { %5026 = vmatpush3.bf16.msra.mxu0 %v5460_v51  ;;  %v5493_v51 = vld [vmem:[#allocation2 + $0x688] sm:$0xff]  }
 0x4c1   :  { %5027 = vmatprep.subr.bf16.mxu0 %v5461_v52  ;;  %v5494_v52 = vld [vmem:[#allocation2 + $0x668] sm:$0xff]  }
 0x4c4   :  { %5028 = vmatpush3.bf16.msra.mxu0 %v5465_v53  ;;  %v5495_v53 = vld [vmem:[#allocation2 + $0x6d0] sm:$0xff]  }
 0x4c5   :  { %5029 = vmatprep.subr.bf16.mxu0 %v5466_v54  ;;  %v5496_v54 = vld [vmem:[#allocation2 + $0x628] sm:$0xff]  }
 0x4c8   :  { %5030 = vmatpush3.bf16.msra.mxu0 %v5470_v55  ;;  %v5497_v55 = vld [vmem:[#allocation2 + $0x690] sm:$0xff]  }
 0x4c9   :  { %3416 = vmatprep.subr.bf16.mxu0 %v5473_v56  ;;  %v5498_v56 = vld [vmem:[#allocation2 + $0x670] sm:$0xff]  }
 0x566   :  { %v4965_v57 = vpop.f32.mrb[32].mxu1 }
 0x567   :  { %v4966_v58 = vpop.f32.mrb[33].mxu1 }
 0x568   :  { %v4967_v59 = vadd.f32 %v4966_v58, %v4965_v57  ;;  %v4968_v60 = vpop.f32.mrb[34].mxu1  ;;  %v5499_v57 = vld [vmem:[#allocation2 + $0x6d8] sm:$0xff]   ;;  %v5500_v58 = vld [vmem:[#allocation2 + $0x630] sm:$0xff]  }
 0x569   :  { %v4969_v62 = vpop.f32.mrb[35].mxu1  ;;  %v5502_v60 = vld [vmem:[#allocation2 + $0x678] sm:$0xff]  }
 0x56a   :  { %v2350_v46 = vadd.f32 %v4967_v59, %v5937_v61  ;;  %v5464_v61 = vld [vmem:[%s6129_s1 + $0x254] ss:$8 sps:$4 sm:$0xff]   ;;  %v5503_v62 = vld [vmem:[#allocation2 + $0x6e0] sm:$0xff]  }
 0x56b   :  { %v5501_v59 = vld [vmem:[#allocation2 + $0x698] sm:$0xff]  }
 0x572   :  { %v2682_v63 = vpop.f32.mrb[36].mxu1  ;;  %v4987_v1 = vpop.f32.mrb[40].mxu0 }
 0x573   :  { %v2689_v2 = vmax.f32 %v2682_v63, 0.0  ;;  %v2684_v3 = vpop.f32.mrb[37].mxu1  ;;  %v4988_v4 = vpop.f32.mrb[41].mxu0  ;;  %v5505_v63 = vld [vmem:[#allocation2 + $0x6a0] sm:$0xff]  }
 0x574   :  { %v2690_v6 = vmax.f32 %v2684_v3, 0.0  ;;  %v4989_v7 = vadd.f32 %v4988_v4, %v4987_v1  ;;  %v4990_v8 = vpop.f32.mrb[42].mxu0  ;;  %v2686_v9 = vpop.f32.mrb[38].mxu1  ;;  %v5506_v1 = vld [vmem:[#allocation2 + $0x6e8] sm:$0xff]   ;;  %v5511_v4 = vld [vmem:[#allocation2 + $0x6f0] sm:$0xff]  }
 0x575   :  { %v2691_v10 = vpack.c.bf16 %v2689_v2, %v2689_v2  ;;  %v4991_v12 = vpop.f32.mrb[43].mxu0  ;;  %v2687_v13 = vpop.f32.mrb[39].mxu1  ;;  %v5509_v2 = vld [vmem:[%s6129_s1 + $0x2a4] ss:$8 sps:$4 sm:$0xff]   ;;  %v5520_v8 = vld [vmem:[#allocation2 + $0x6b8] sm:$0xff]  }
 0x576   :  { %v2692_v14 = vpack.c.bf16 %v2690_v6, %v2690_v6  ;;  %v5991_v15 = vadd.f32 %v4989_v7, %v2350_v46  ;;  %v5504_v46 = vld [vmem:[#allocation2 + $0x638] sm:$0xff]   ;;  %v5510_v3 = vld [vmem:[#allocation2 + $0x6a8] sm:$0xff]   ;;  %v5515_v6 = vld [vmem:[#allocation2 + $0x6b0] sm:$0xff]  }
 0x577   :  { %v5516_v7 = vld [vmem:[#allocation2 + $0x6f8] sm:$0xff]  }
 0x578   :  { %2854 = vmatprep.mubr.bf16.mxu1 %v2692_v14  ;;  %v5523_v9 = vld [vmem:[%s6129_s1 + $0x2d4] ss:$8 sps:$4 sm:$0xff]  }
 0x579   :  { %2855 = vmatmul.mubr.bf16.vlgmr.msra.gmra.mrb[40].mxu1 %v2691_v10 }
 0x57a   :  { %3161 = vmatpush1.bf16.msra.mxu1 %v5457_v16  ;;  %3192 = vmatprep.mubr.bf16.mxu1 %v5627_v0 }
 0x57b   :  { %3162 = vmatprep.subr.bf16.mxu1 %v5464_v61 }
 0x57e   :  { %3163 = vmatpush1.bf16.msra.mxu1 %v5462_v18  ;;  %v2938_v21 = vpop.f32.mrb[44].mxu0 }
 0x57f   :  { %v2945_v23 = vmax.f32 %v2938_v21, 0.0  ;;  %v2940_v24 = vpop.f32.mrb[45].mxu0  ;;  %3164 = vmatprep.subr.bf16.mxu1 %v3158_v20 }
 0x580   :  { %v2946_v27 = vmax.f32 %v2940_v24, 0.0  ;;  %v2942_v26 = vpop.f32.mrb[46].mxu0 }
 0x581   :  { %v2943_v28 = vpop.f32.mrb[47].mxu0  ;;  %v2947_v32 = vpack.c.bf16 %v2945_v23, %v2945_v23 }
 0x582   :  { %v2948_v29 = vpack.c.bf16 %v2946_v27, %v2946_v27  ;;  %3165 = vmatpush1.bf16.msra.mxu1 %v3155_v22 }
 0x583   :  { %5037 = vmatprep.subr.bf16.mxu1 %v5480_v25 }
 0x584   :  { %3110 = vmatprep.mubr.bf16.mxu0 %v2948_v29 }
 0x585   :  { %4658 = vmatmul.mubr.msk.bf16.vlgmr.msra.gmra.mrb[44].mxu1 %vm77_vm2, %v5980_v5  ;;  %3111 = vmatmul.mubr.bf16.vlgmr.msra.gmra.mrb[48].mxu0 %v2947_v32  ;;  %v5507_v32 = vld [vmem:[%s6129_s1 + $0x2a0] ss:$8 sps:$4 sm:$0xff]  }
 0x586   :  { %3417 = vmatpush1.bf16.msra.mxu0 %v5471_v30  ;;  %3448 = vmatprep.mubr.bf16.mxu0 %v5627_v0 }
 0x587   :  { %3418 = vmatprep.subr.bf16.mxu0 %v5476_v33  ;;  %5038 = vmatpush3.bf16.msra.mxu1 %v5481_v35  ;;  %v5519_v33 = vld [vmem:[%s6129_s1 + $0x2c4] ss:$8 sps:$4 sm:$0x1f]   ;;  %v5517_v35 = vld [vmem:[%s6129_s1 + $0x2c0] ss:$8 sps:$4 sm:$0x1f]  }
 0x588   :  { %5039 = vmatprep.subr.bf16.mxu1 %v5482_v36  ;;  %v3670_v36 = vand.u32 %v5519_v33, %v5710_v11  ;;  %v3667_v38 = vand.u32 %v5517_v35, %v5710_v11 }
 0x58a   :  { %3419 = vmatpush1.bf16.msra.mxu0 %v5474_v37 }
 0x58b   :  { %3420 = vmatprep.subr.bf16.mxu0 %v3414_v39  ;;  %5040 = vmatpush3.bf16.msra.mxu1 %v5483_v40 }
 0x58c   :  { %5041 = vmatprep.subr.bf16.mxu1 %v5484_v41  ;;  %v5530_v41 = vld [vmem:[#allocation2 + $0x740] sm:$0xff]  }
 0x58e   :  { %3421 = vmatpush1.bf16.msra.mxu0 %v3411_v42 }
 0x58f   :  { %5042 = vmatpush3.bf16.msra.mxu1 %v5485_v43  ;;  %5059 = vmatprep.subr.bf16.mxu0 %v5487_v44 }
 0x590   :  { %5043 = vmatprep.subr.bf16.mxu1 %v5486_v45 }
 0x591   :  { %4687 = vmatmul.mubr.msk.bf16.vlgmr.msra.gmra.mrb[52].mxu0 %vm77_vm2, %v5980_v5 }
 0x592   :  { %5060 = vmatpush3.bf16.msra.mxu0 %v5489_v47  ;;  %v5521_v47 = vld [vmem:[%s6129_s1 + $0x2d0] ss:$8 sps:$4 sm:$0xff]  }
 0x593   :  { %5044 = vmatpush3.bf16.msra.mxu1 %v5488_v31  ;;  %5061 = vmatprep.subr.bf16.mxu0 %v5491_v49  ;;  %v5529_v49 = vld [vmem:[%s6129_s1 + $0x2f4] ss:$8 sps:$4 sm:$0x1f]  }
 0x594   :  { %5045 = vmatprep.subr.bf16.mxu1 %v5490_v48  ;;  %v5526_v48 = vld [vmem:[%s6129_s1 + $0x2e4] ss:$8 sps:$4 sm:$0xff]  }
 0x596   :  { %5062 = vmatpush3.bf16.msra.mxu0 %v5493_v51  ;;  %v5532_v51 = vld [vmem:[#allocation2 + $0x748] sm:$0xff]  }
 0x597   :  { %5046 = vmatpush3.bf16.msra.mxu1 %v5492_v50  ;;  %5063 = vmatprep.subr.bf16.mxu0 %v5495_v53  ;;  %v5531_v50 = vld [vmem:[#allocation2 + $0x700] sm:$0xff]   ;;  %v5527_v53 = vld [vmem:[%s6129_s1 + $0x2f0] ss:$8 sps:$4 sm:$0x1f]  }
 0x598   :  { %5047 = vmatprep.subr.bf16.mxu1 %v5494_v52  ;;  %v5524_v52 = vld [vmem:[%s6129_s1 + $0x2e0] ss:$8 sps:$4 sm:$0xff]  }
 0x59a   :  { %5064 = vmatpush3.bf16.msra.mxu0 %v5497_v55  ;;  %v5533_v55 = vld [vmem:[#allocation2 + $0x708] sm:$0xff]  }
 0x59b   :  { %5048 = vmatpush3.bf16.msra.mxu1 %v5496_v54  ;;  %5065 = vmatprep.subr.bf16.mxu0 %v5499_v57  ;;  %v3926_v54 = vand.u32 %v5529_v49, %v5710_v11  ;;  %v3923_v57 = vand.u32 %v5527_v53, %v5710_v11  ;;  %v5542_v11 = vld [vmem:[#allocation2 + $0x720] sm:$0xff]   ;;  %v5565_v53 = vld [vmem:[%s6132_s4 + $0x18] sm:$0xff]  }
 0x59c   :  { %5049 = vmatprep.subr.bf16.mxu1 %v5498_v56  ;;  %v5534_v56 = vld [vmem:[#allocation2 + $0x750] sm:$0xff]  }
 0x59e   :  { %5066 = vmatpush3.bf16.msra.mxu0 %v5501_v59  ;;  %v5537_v59 = vld [vmem:[#allocation2 + $0x7c0] sm:$0xff]  }
 0x59f   :  { %5050 = vmatpush3.bf16.msra.mxu1 %v5500_v58  ;;  %5067 = vmatprep.subr.bf16.mxu0 %v5503_v62  ;;  %v5535_v58 = vld [vmem:[#allocation2 + $0x710] sm:$0xff]   ;;  %v5539_v62 = vld [vmem:[#allocation2 + $0x780] sm:$0xff]  }
 0x5a0   :  { %5051 = vmatprep.subr.bf16.mxu1 %v5502_v60  ;;  %v5536_v60 = vld [vmem:[#allocation2 + $0x758] sm:$0xff]  }
 0x5a2   :  { %5068 = vmatpush3.bf16.msra.mxu0 %v5505_v63  ;;  %v5541_v63 = vld [vmem:[#allocation2 + $0x7c8] sm:$0xff]  }
 0x5a3   :  { %5052 = vmatpush3.bf16.msra.mxu1 %v5504_v46  ;;  %5069 = vmatprep.subr.bf16.mxu0 %v5506_v1  ;;  %v5540_v46 = vld [vmem:[#allocation2 + $0x760] sm:$0xff]   ;;  %v5543_v1 = vld [vmem:[#allocation2 + $0x788] sm:$0xff]  }
 0x5a4   :  { %3672 = vmatprep.subr.bf16.mxu1 %v5509_v2  ;;  %v5544_v2 = vld [vmem:[#allocation2 + $0x768] sm:$0xff]  }
 0x5a6   :  { %5070 = vmatpush3.bf16.msra.mxu0 %v5510_v3  ;;  %v5545_v3 = vld [vmem:[#allocation2 + $0x7d0] sm:$0xff]  }
 0x5a7   :  { %5071 = vmatprep.subr.bf16.mxu0 %v5511_v4  ;;  %v5546_v4 = vld [vmem:[#allocation2 + $0x728] sm:$0xff]  }
 0x5aa   :  { %5072 = vmatpush3.bf16.msra.mxu0 %v5515_v6  ;;  %v5547_v6 = vld [vmem:[#allocation2 + $0x790] sm:$0xff]  }
 0x5ab   :  { %5073 = vmatprep.subr.bf16.mxu0 %v5516_v7  ;;  %v5548_v7 = vld [vmem:[#allocation2 + $0x770] sm:$0xff]  }
 0x5ae   :  { %5074 = vmatpush3.bf16.msra.mxu0 %v5520_v8  ;;  %v5549_v8 = vld [vmem:[#allocation2 + $0x7d8] sm:$0xff]  }
 0x5af   :  { %3928 = vmatprep.subr.bf16.mxu0 %v5523_v9  ;;  %v5551_v9 = vld [vmem:[#allocation2 + $0x798] sm:$0xff]  }
 0x64c   :  { %v5009_v10 = vpop.f32.mrb[40].mxu1 }
 0x64d   :  { %v5010_v12 = vpop.f32.mrb[41].mxu1 }
 0x64e   :  { %v5011_v13 = vadd.f32 %v5010_v12, %v5009_v10  ;;  %v5012_v14 = vpop.f32.mrb[42].mxu1  ;;  %v5552_v10 = vld [vmem:[#allocation2 + $0x778] sm:$0xff]   ;;  %v5553_v12 = vld [vmem:[#allocation2 + $0x7e0] sm:$0xff]  }
 0x64f   :  { %v5013_v16 = vpop.f32.mrb[43].mxu1  ;;  %v5555_v14 = vld [vmem:[#allocation2 + $0x7a0] sm:$0xff]  }
 0x650   :  { %v2862_v61 = vadd.f32 %v5011_v13, %v5991_v15  ;;  %v5514_v15 = vld [vmem:[%s6129_s1 + $0x2b4] ss:$8 sps:$4 sm:$0xff]   ;;  %v5556_v16 = vld [vmem:[#allocation2 + $0x7e8] sm:$0xff]  }
 0x651   :  { %v5554_v13 = vld [vmem:[#allocation2 + $0x738] sm:$0xff]  }
 0x658   :  { %v3194_v17 = vpop.f32.mrb[44].mxu1  ;;  %v5031_v18 = vpop.f32.mrb[48].mxu0 }
 0x659   :  { %v3201_v19 = vmax.f32 %v3194_v17, 0.0  ;;  %v3196_v20 = vpop.f32.mrb[45].mxu1  ;;  %v5032_v21 = vpop.f32.mrb[49].mxu0  ;;  %v5558_v17 = vld [vmem:[#allocation2 + $0x7f0] sm:$0xff]  }
 0x65a   :  { %v3202_v22 = vmax.f32 %v3196_v20, 0.0  ;;  %v5033_v23 = vadd.f32 %v5032_v21, %v5031_v18  ;;  %v5034_v24 = vpop.f32.mrb[50].mxu0  ;;  %v3198_v25 = vpop.f32.mrb[46].mxu1  ;;  %v5559_v18 = vld [vmem:[#allocation2 + $0x7b0] sm:$0xff]   ;;  %v5561_v20 = vld [vmem:[#allocation2 + $0x7b8] sm:$0xff]   ;;  %v5629_v21 = vmov 0.0  }
 0x65b   :  { %v3203_v27 = vpack.c.bf16 %v3201_v19, %v3201_v19  ;;  %v5035_v26 = vpop.f32.mrb[51].mxu0  ;;  %v3199_v28 = vpop.f32.mrb[47].mxu1  ;;  %v5560_v19 = vld [vmem:[#allocation2 + $0x7f8] sm:$0xff]  }
 0x65c   :  { %v3204_v29 = vpack.c.bf16 %v3202_v22, %v3202_v22  ;;  %v6040_v30 = vadd.f32 %v5033_v23, %v2862_v61  ;;  %v5557_v61 = vld [vmem:[#allocation2 + $0x7a8] sm:$0xff]  }
 0x65e   :  { %3366 = vmatprep.mubr.bf16.mxu1 %v3204_v29 }
 0x65f   :  { %3367 = vmatmul.mubr.bf16.vlgmr.msra.gmra.mrb[48].mxu1 %v3203_v27 }
 0x660   :  { %3673 = vmatpush1.bf16.msra.mxu1 %v5507_v32  ;;  %3704 = vmatprep.mubr.bf16.mxu1 %v5627_v0 }
 0x661   :  { %3674 = vmatprep.subr.bf16.mxu1 %v5514_v15 }
 0x664   :  { %3675 = vmatpush1.bf16.msra.mxu1 %v5512_v34  ;;  %v3450_v37 = vpop.f32.mrb[52].mxu0 }
 0x665   :  { %v3457_v39 = vmax.f32 %v3450_v37, 0.0  ;;  %v3452_v40 = vpop.f32.mrb[53].mxu0  ;;  %3676 = vmatprep.subr.bf16.mxu1 %v3670_v36 }
 0x666   :  { %v3458_v42 = vmax.f32 %v3452_v40, 0.0  ;;  %v3454_v43 = vpop.f32.mrb[54].mxu0 }
 0x667   :  { %v3455_v44 = vpop.f32.mrb[55].mxu0  ;;  %v3459_v31 = vpack.c.bf16 %v3457_v39, %v3457_v39  ;;  %v5562_v43 = vld [vmem:[%s6132_s4] sm:$0xff]  }
 0x668   :  { %v3460_v45 = vpack.c.bf16 %v3458_v42, %v3458_v42  ;;  %3677 = vmatpush1.bf16.msra.mxu1 %v3667_v38 }
 0x669   :  { %5081 = vmatprep.subr.bf16.mxu1 %v5530_v41 }
 0x66a   :  { %3622 = vmatprep.mubr.bf16.mxu0 %v3460_v45 }
 0x66b   :  { %4716 = vmatmul.mubr.msk.bf16.vlgmr.msra.gmra.mrb[52].mxu1 %vm77_vm2, %v5980_v5  ;;  %3623 = vmatmul.mubr.bf16.vlgmr.msra.gmra.mrb[56].mxu0 %v3459_v31 }
 0x66c   :  { %3929 = vmatpush1.bf16.msra.mxu0 %v5521_v47  ;;  %3960 = vmatprep.mubr.bf16.mxu0 %v5627_v0  ;;  %v5538_v0 = vld [vmem:[#allocation2 + $0x718] sm:$0xff]  }
 0x66d   :  { %3930 = vmatprep.subr.bf16.mxu0 %v5526_v48  ;;  %5082 = vmatpush3.bf16.msra.mxu1 %v5531_v50 }
 0x66e   :  { %5083 = vmatprep.subr.bf16.mxu1 %v5532_v51 }
 0x670   :  { %3931 = vmatpush1.bf16.msra.mxu0 %v5524_v52  ;;  %v5564_v52 = vld [vmem:[%s6132_s4 + $0x10] sm:$0xff]  }
 0x671   :  { %3932 = vmatprep.subr.bf16.mxu0 %v3926_v54  ;;  %5084 = vmatpush3.bf16.msra.mxu1 %v5533_v55  ;;  %v5566_v54 = vld [vmem:[%s6132_s4 + $0x20] sm:$0xff]   ;;  %v5567_v55 = vld [vmem:[%s6132_s4 + $0x28] sm:$0xff]  }
 0x672   :  { %5085 = vmatprep.subr.bf16.mxu1 %v5534_v56  ;;  %v5568_v56 = vld [vmem:[%s6132_s4 + $0x30] sm:$0xff]  }
 0x674   :  { %3933 = vmatpush1.bf16.msra.mxu0 %v3923_v57  ;;  %v5569_v57 = vld [vmem:[%s6132_s4 + $0x38] sm:$0xff]  }
 0x675   :  { %5086 = vmatpush3.bf16.msra.mxu1 %v5535_v58  ;;  %5103 = vmatprep.subr.bf16.mxu0 %v5537_v59  ;;  %v4264_v58 = vld [vmem:[%s6134_s6] sm:$0xff] }
 0x676   :  { %5087 = vmatprep.subr.bf16.mxu1 %v5536_v60  ;;  %v4273_v59 = vmul.f32 %v4264_v58, %v4264_v58 }
 0x677   :  { %4745 = vmatmul.mubr.msk.bf16.vlgmr.msra.gmra.mrb[60].mxu0 %vm77_vm2, %v5980_v5  ;;  %v5550_v5 = vld [vmem:[#allocation2 + $0x730] sm:$0xff]  }
 0x678   :  { %5104 = vmatpush3.bf16.msra.mxu0 %v5539_v62  ;;  %4274 = vadd.xlane.f32.xlu0 %v4273_v59 }
 0x679   :  { %5088 = vmatpush3.bf16.msra.mxu1 %v5538_v0  ;;  %5105 = vmatprep.subr.bf16.mxu0 %v5541_v63 }
 0x67a   :  { %5089 = vmatprep.subr.bf16.mxu1 %v5540_v46 }
 0x67c   :  { %5106 = vmatpush3.bf16.msra.mxu0 %v5543_v1 }
 0x67d   :  { %5090 = vmatpush3.bf16.msra.mxu1 %v5542_v11  ;;  %5107 = vmatprep.subr.bf16.mxu0 %v5545_v3 }
 0x67e   :  { %5091 = vmatprep.subr.bf16.mxu1 %v5544_v2 }
 0x680   :  { %5108 = vmatpush3.bf16.msra.mxu0 %v5547_v6  ;;  %v4762_v6 = vld [vmem:[%s6131_s3] ss:$0 sm:$0xff]  ;;  %s5631_s3 = smov [#allocation5]  }
 0x681   :  { %5092 = vmatpush3.bf16.msra.mxu1 %v5546_v4  ;;  %5109 = vmatprep.subr.bf16.mxu0 %v5549_v8 }
 0x682   :  { %5093 = vmatprep.subr.bf16.mxu1 %v5548_v7 }
 0x684   :  { %5110 = vmatpush3.bf16.msra.mxu0 %v5551_v9 }
 0x685   :  { %5094 = vmatpush3.bf16.msra.mxu1 %v5550_v5  ;;  %5111 = vmatprep.subr.bf16.mxu0 %v5553_v12  ;;  %v4763_v12 = vld [vmem:[%s6133_s5] ss:$0 sm:$0xff]  ;;  %s4295_s5 = sshll.u32 %s5631_s3, 4  ;;  %s4296_s5 = int_to_ptr.vmem [resolvable:$true] %s4295_s5 }
 0x686   :  { %5095 = vmatprep.subr.bf16.mxu1 %v5552_v10  ;;  %s5598_s13 = scalar_lea.vmem %s4296_s5, 128  ;;  %p5603_p9 = scmp.lt.s32.totalorder %s4296_s5, %s4296_s5 }
 0x687   :  { %p5599_p8 = scmp.ne.s32.totalorder %s4296_s5, %s5598_s13  ;;  %p5604_p10 = scmp.lt.s32.totalorder %s5598_s13, %s5598_s13 }
 0x688   :  { %5112 = vmatpush3.bf16.msra.mxu0 %v5555_v14 }
 0x689   :  { %5096 = vmatpush3.bf16.msra.mxu1 %v5554_v13  ;;  %5113 = vmatprep.subr.bf16.mxu0 %v5556_v16  ;;  %p5605_p11 = por %p5604_p10, %p5603_p9 }
 0x68a   :  { %5134 = vmatprep.subr.bf16.mxu1 %v5629_v21 }
 0x68b   :  { %p5606_p12 = pnand %p5605_p11, %p5599_p8 }
 0x68c   :  { %5114 = vmatpush3.bf16.msra.mxu0 %v5557_v61 }
 0x68d   :  { %5115 = vmatprep.subr.bf16.mxu0 %v5558_v17 }
 0x690   :  { %5116 = vmatpush3.bf16.msra.mxu0 %v5559_v18 }
 0x691   :  { %5117 = vmatprep.subr.bf16.mxu0 %v5560_v19  ;;  %v4278_v19 = vlaneseq }
 0x694   :  { %5118 = vmatpush3.bf16.msra.mxu0 %v5561_v20 }
 0x732   :  { %v5053_v22 = vpop.f32.mrb[48].mxu1 }
 0x733   :  { %v5054_v23 = vpop.f32.mrb[49].mxu1 }
 0x734   :  { %v5055_v24 = vadd.f32 %v5054_v23, %v5053_v22  ;;  %v5056_v25 = vpop.f32.mrb[50].mxu1  ;;  %v4279_v22 = vand.u32 127, %v4278_v19  ;;  %v4275_v23 = vpop.xlane.xlu0 %4274 }
 0x735   :  { %v5057_v27 = vpop.f32.mrb[51].mxu1  ;;  %v4271_v25 = vmul.f32 0.05, %v4264_v58 }
 0x736   :  { %v3374_v26 = vadd.f32 %v5055_v24, %v6040_v30  ;;  %v5563_v30 = vld [vmem:[%s6132_s4 + $0x8] sm:$0xff]   ;;  %vm4281_vm4 = vcmp.ge.s32.totalorder %v4279_v22, 64  ;;  %vm4282_vm5 = vcmp.lt.s32.totalorder %v4279_v22, 68  ;;  %v4276_v24 = vmul.f32 -0.5, %v4275_v23 }
 0x737   :  { %vm4280_vm6 = vcmp.lt.s32.totalorder %v4279_v22, 4  ;;  %vm4283_vm7 = vmand %vm4281_vm4, %vm4282_vm5  ;;  %vm4286_vm9 = vcmp.eq.s32.totalorder %v4279_v22, 5 }
 0x738   :  { %vm4284_vm8 = vmor %vm4280_vm6, %vm4283_vm7 }
 0x73e   :  { %v3706_v28 = vpop.f32.mrb[52].mxu1  ;;  %v5075_v29 = vpop.f32.mrb[56].mxu0 }
 0x73f   :  { %v3713_v32 = vmax.f32 %v3706_v28, 0.0  ;;  %v3708_v15 = vpop.f32.mrb[53].mxu1  ;;  %v5076_v33 = vpop.f32.mrb[57].mxu0 }
 0x740   :  { %v3714_v34 = vmax.f32 %v3708_v15, 0.0  ;;  %v5077_v35 = vadd.f32 %v5076_v33, %v5075_v29  ;;  %v5078_v36 = vpop.f32.mrb[58].mxu0  ;;  %v3710_v37 = vpop.f32.mrb[54].mxu1 }
 0x741   :  { %v3715_v38 = vpack.c.bf16 %v3713_v32, %v3713_v32  ;;  %v5079_v39 = vpop.f32.mrb[59].mxu0  ;;  %v3711_v40 = vpop.f32.mrb[55].mxu1 }
 0x742   :  { %v3716_v41 = vpack.c.bf16 %v3714_v34, %v3714_v34  ;;  %v3630_v42 = vadd.f32 %v5077_v35, %v3374_v26  ;;  %v4277_v26 = vadd.f32 8.307175, %v4276_v24 }
 0x744   :  { %3878 = vmatprep.mubr.bf16.mxu1 %v3716_v41 }
 0x745   :  { %3879 = vmatmul.mubr.bf16.vlgmr.msra.gmra.mrb[56].mxu1 %v3715_v38 }
 0x746   :  { %5135 = vmatpush3.bf16.msra.mxu1 %v5562_v43  ;;  %5150 = vmatprep.mubr.msk.bf16.mxu1 %vm5630_vm3, %v5629_v21 }
 0x747   :  { %5136 = vmatprep.subr.bf16.mxu1 %v5629_v21 }
 0x74a   :  { %v3962_v44 = vpop.f32.mrb[60].mxu0  ;;  %5137 = vmatpush3.bf16.msra.mxu1 %v5563_v30 }
 0x74b   :  { %v3969_v45 = vmax.f32 %v3962_v44, 0.0  ;;  %v3964_v47 = vpop.f32.mrb[61].mxu0  ;;  %5138 = vmatprep.subr.bf16.mxu1 %v5629_v21 }
 0x74c   :  { %v3970_v31 = vmax.f32 %v3964_v47, 0.0  ;;  %v3966_v48 = vpop.f32.mrb[62].mxu0 }
 0x74d   :  { %v3967_v49 = vpop.f32.mrb[63].mxu0  ;;  %v3971_v51 = vpack.c.bf16 %v3969_v45, %v3969_v45 }
 0x74e   :  { %v3972_v50 = vpack.c.bf16 %v3970_v31, %v3970_v31  ;;  %5139 = vmatpush3.bf16.msra.mxu1 %v5564_v52 }
 0x74f   :  { %5140 = vmatprep.subr.bf16.mxu1 %v5629_v21 }
 0x750   :  { %4134 = vmatprep.mubr.bf16.mxu0 %v3972_v50 }
 0x751   :  { %4135 = vmatmul.mubr.bf16.vlgmr.msra.gmra.mrb[64].mxu0 %v3971_v51 }
 0x752   :  { %5141 = vmatpush3.bf16.msra.mxu1 %v5565_v53 }
 0x753   :  { %5142 = vmatprep.subr.bf16.mxu1 %v5629_v21 }
 0x756   :  { %5143 = vmatpush3.bf16.msra.mxu1 %v5566_v54 }
 0x757   :  { %5144 = vmatprep.subr.bf16.mxu1 %v5629_v21 }
 0x75a   :  { %5145 = vmatpush3.bf16.msra.mxu1 %v5567_v55 }
 0x75b   :  { %5146 = vmatprep.subr.bf16.mxu1 %v5629_v21 }
 0x75e   :  { %5147 = vmatpush3.bf16.msra.mxu1 %v5568_v56 }
 0x75f   :  { %5148 = vmatprep.subr.bf16.mxu1 %v5629_v21 }
 0x762   :  { %5149 = vmatpush3.bf16.msra.mxu1 %v5569_v57 }
 0x818   :  { %v5097_v60 = vpop.f32.mrb[56].mxu1 }
 0x819   :  { %v5098_v62 = vpop.f32.mrb[57].mxu1 }
 0x81a   :  { %v5099_v0 = vadd.f32 %v5098_v62, %v5097_v60  ;;  %v5100_v46 = vpop.f32.mrb[58].mxu1 }
 0x81b   :  { %v5101_v63 = vpop.f32.mrb[59].mxu1 }
 0x81c   :  { %v3886_v11 = vadd.f32 %v5099_v0, %v3630_v42 }
 0x824   :  { %v5119_v1 = vpop.f32.mrb[64].mxu0 }
 0x825   :  { %v5120_v2 = vpop.f32.mrb[65].mxu0 }
 0x826   :  { %v5121_v3 = vadd.f32 %v5120_v2, %v5119_v1  ;;  %v5122_v4 = vpop.f32.mrb[66].mxu0 }
 0x827   :  { %v5123_v7 = vpop.f32.mrb[67].mxu0 }
 0x828   :  { %v4142_v8 = vadd.f32 %v5121_v3, %v3886_v11 }
 0x82a   :  { %v4150_v5 = vadd.f32 %v4762_v6, %v4142_v8 }
 0x82c   :  { %v4151_v9 = vmax.f32 %v4150_v5, 0.0 }
 0x82e   :  { %v4152_v10 = vpack.c.bf16 %v4151_v9, %v4151_v9 }
 0x830   :  { %5151 = vmatmul.mubr.bf16.vlgmr.msra.gmra.mrb[60].mxu1 %v4152_v10 }
 0x903   :  { %v4258_v13 = vpop.f32.mrb[60].mxu1 }
 0x904   :  { %v4259_v14 = vadd.f32 %v4763_v12, %v4258_v13  ;;  %v5152_v16 = vpop.f32.mrb[61].mxu1 }
 0x905   :  { %v4261_v61 = vpop.f32.mrb[62].mxu1 }
 0x906   :  { %v4772_v17 = vmul.f32 -1.442695, %v4259_v14  ;;  %v5153_v18 = vpop.f32.mrb[63].mxu1 }
 0x908   :  { %5570 = vpow2.f32 %v4772_v17 }
 0x912   :  { %v5571_v20 = vpop.eup %5570 }
 0x913   :  { %v4268_v21 = vadd.f32 1.0, %v5571_v20 }
 0x915   :  { %5572 = vrcp.f32 %v4268_v21 }
 0x91f   :  { %v5573_v27 = vpop.eup %5572 }
 0x920   :  { %v4272_v28 = vadd.f32 %v5573_v27, %v4271_v25 }
 0x922   :  { %v4285_v29 = vsel %vm4284_vm8, %v4272_v28, %v4259_v14 }
 0x923   :  { %v4287_v32 = vsel %vm4286_vm9, %v4277_v26, %v4285_v29 }
 0x924   :  { %4288 = vst [vmem:[#allocation5] sm:$0xff] %v4287_v32 }
 0x925   :  { %5609 = shalt.err (!%p5606_p12)
}
 0x926   :  { %s5610_s16 = scalar_lea.hbm %s6135_s7, 128 }
 0x927   :  { %p5611_p13 = scmp.ne.s32.totalorder %s6135_s7, %s5610_s16  ;;  %p5614_p0 = scmp.lt.u32.totalorder %s5610_s16, %s6135_s7 }
 0x929   :  { %p5616_p1 = pnand %p5614_p0, %p5611_p13 }
 0x92b   :  { %5619 = shalt.err (!%p5616_p1)
}
 0x92c   :  { %4298 = dma.vmem_to_hbm [thread:$0]  %s4296_s5, 128, %s6135_s7, [#allocation4]  }
 0x92d   :  { %5622 = dma.done.wait [#allocation4], 128  }
 0x92e   :  { %5623 = vsyncadd [#allocation4], 4294967168 }
 0x92f   :  { %4302 = vsyncpa [#allocation3], 1 }
 0x930   :  { %4303 = vsyncpa [#allocation4], 1 }

</bundles_post_ra>
